<compile_context>
chip_gen: v7x
topology: tpu7x:2x2x1
jax: 0.10.0
libtpu: 0.0.40
codegen_flags: <defaults>
</compile_context>

<pallas_src>
import numpy as np
import jax
import jax.numpy as jnp
from jax.experimental import pallas as pl
from jax.experimental.pallas import tpu as pltpu

NUM_LGT_SGS = 24
DIMS = [128, 128, 128, 128]
MULTIRES = 10
P_INPUT_DIM = 3 + 3 * 2 * MULTIRES   # 63 (include_input + sin/cos of 10 freqs)
ANG = 3 * MULTIRES                   # 30 raw angles (points * 2^k)
ANG_PAD = 32                         # padded to an aligned lane count
OUT_RAW = NUM_LGT_SGS * 6            # 144
OUT_FINAL = NUM_LGT_SGS * 7          # 168


def _round_up(x, m):
    return ((x + m - 1) // m) * m


# ----------------------------------------------------------------------------
# Plain-JAX glue
# ----------------------------------------------------------------------------
def embed_points(points):
    """Full NeRF positional embedding (reference only): [x, sin(2^k x), cos(2^k x)]."""
    feats = [points]
    for f in (2.0 ** np.arange(MULTIRES)).astype(np.float32):
        feats.append(jnp.sin(points * float(f)))
        feats.append(jnp.cos(points * float(f)))
    return jnp.concatenate(feats, axis=-1)  # (B, 63)


def embed_angles(points):
    """Exact f32 angles points*2^k (k=0..9), layout [:, 3k+c], zero-padded to 32 lanes."""
    freqs = jnp.asarray(2.0 ** np.arange(MULTIRES), jnp.float32)          # (10,)
    ang = (points[:, None, :] * freqs[:, None]).reshape(points.shape[0], ANG)
    return jnp.pad(ang, ((0, 0), (0, ANG_PAD - ANG)))                     # (B, 32)


def _prepare_params(params):
    """Split/permute weights to the kernel layout; cast matmul operands to bf16."""
    (w0, b0), (w1, b1), (w2, b2), (w3, b3), (w4, b4) = params

    # W0 rows: [p(3), sin(2^0 p)(3), cos(2^0 p)(3), sin(2^1 p)(3), ...]
    rows = np.arange(P_INPUT_DIM)
    sc = rows[3:].reshape(MULTIRES, 2, 3)
    idx_sin = sc[:, 0, :].reshape(-1)     # rows multiplying sin(angles), order 3k+c
    idx_cos = sc[:, 1, :].reshape(-1)     # rows multiplying cos(angles)

    w0p = w0[:3].astype(jnp.float32)                                      # (3, 128)
    w0s = jnp.zeros((ANG_PAD, DIMS[0]), jnp.float32).at[:ANG].set(w0[idx_sin])
    w0c = jnp.zeros((ANG_PAD, DIMS[0]), jnp.float32).at[:ANG].set(w0[idx_cos])

    # Final layer: permute columns from SG-major (s*6 + c) to channel-major (c*24 + s)
    perm = np.arange(OUT_RAW).reshape(NUM_LGT_SGS, 6).T.reshape(-1)
    w4p, b4p = w4[:, perm], b4[perm]

    bf = jnp.bfloat16
    return [
        w0p,                                     # f32, used on the VPU (K=3)
        w0s.astype(bf), w0c.astype(bf), b0.reshape(1, -1).astype(jnp.float32),
        w1.astype(bf), b1.reshape(1, -1).astype(jnp.float32),
        w2.astype(bf), b2.reshape(1, -1).astype(jnp.float32),
        w3.astype(bf), b3.reshape(1, -1).astype(jnp.float32),
        w4p.astype(bf), b4p.reshape(1, -1).astype(jnp.float32),
    ]


# ----------------------------------------------------------------------------
# Kernel
# ----------------------------------------------------------------------------
def _irsg_kernel(a_ref, w0p_ref, w0s_ref, w0c_ref, b0_ref,
                 w1_ref, b1_ref, w2_ref, b2_ref, w3_ref, b3_ref,
                 w4_ref, b4_ref, o_ref):
    f32 = jnp.float32
    bf16 = jnp.bfloat16

    a = a_ref[...]                                   # (tb, 32) f32 angles (cols 30/31 = 0)
    s = jnp.sin(a).astype(bf16)
    c = jnp.cos(a).astype(bf16)

    # Layer 0: split matmul (sin/cos parts on the MXU, raw-point part on the VPU).
    acc = jnp.dot(s, w0s_ref[...], preferred_element_type=f32)
    acc = acc + jnp.dot(c, w0c_ref[...], preferred_element_type=f32)
    w0p = w0p_ref[...]                               # (3, 128) f32; angles[:, 0:3] == points
    acc = acc + a[:, 0:1] * w0p[0:1, :]
    acc = acc + a[:, 1:2] * w0p[1:2, :]
    acc = acc + a[:, 2:3] * w0p[2:3, :]
    h = jnp.maximum(acc + b0_ref[...], 0.0).astype(bf16)

    # Layers 1-3: bf16 operands, f32 accumulation.
    h = jnp.maximum(jnp.dot(h, w1_ref[...], preferred_element_type=f32) + b1_ref[...], 0.0).astype(bf16)
    h = jnp.maximum(jnp.dot(h, w2_ref[...], preferred_element_type=f32) + b2_ref[...], 0.0).astype(bf16)
    h = jnp.maximum(jnp.dot(h, w3_ref[...], preferred_element_type=f32) + b3_ref[...], 0.0).astype(bf16)

    # Output layer (channel-major columns: [theta, phi, lambda, mu0, mu1, mu2] x 24 SGs).
    raw = jnp.dot(h, w4_ref[...], preferred_element_type=f32) + b4_ref[...]   # (tb, 144) f32

    N = NUM_LGT_SGS
    two_pi = jnp.float32(2.0 * np.pi)
    sig = jax.nn.sigmoid(raw[:, 0:3 * N])            # single 72-lane sigmoid
    theta = sig[:, 0 * N:1 * N] * two_pi
    phi = sig[:, 1 * N:2 * N] * two_pi
    lam = sig[:, 2 * N:3 * N] * 30.0 + 0.1
    mu = jnp.maximum(raw[:, 3 * N:6 * N], 0.0)       # single 72-lane ReLU
    sin_phi = jnp.sin(phi)

    # Build the whole (tb, 168) tile in registers and do one lane-dense store.
    out = jnp.concatenate(
        [jnp.cos(theta) * sin_phi,                   # lobe_x
         jnp.sin(theta) * sin_phi,                   # lobe_y
         jnp.cos(phi),                               # lobe_z
         lam,                                        # lambda
         mu],                                        # mu0, mu1, mu2
        axis=-1)
    o_ref[...] = out.astype(o_ref.dtype)


# ----------------------------------------------------------------------------
# Wrapper
# ----------------------------------------------------------------------------
def irsg_forward(points, params, *, tb=1024):
    B = points.shape[0]
    flat = _prepare_params(params)
    ang = embed_angles(points.astype(jnp.float32))            # (B, 32) f32

    # Batch tiling: large tiles to feed the MXU, padded so any B works.
    tb_eff = min(tb, _round_up(B, 8))
    Bp = _round_up(B, tb_eff)
    if Bp != B:
        ang = jnp.pad(ang, ((0, Bp - B), (0, 0)))

    in_specs = [pl.BlockSpec((tb_eff, ANG_PAD), lambda i: (i, 0))]
    for arr in flat:
        in_specs.append(pl.BlockSpec(arr.shape, lambda i: (0, 0)))

    out_flat = pl.pallas_call(
        _irsg_kernel,
        out_shape=jax.ShapeDtypeStruct((Bp, OUT_FINAL), jnp.float32),
        grid_spec=pltpu.PrefetchScalarGridSpec(
            num_scalar_prefetch=0,
            grid=(Bp // tb_eff,),
            in_specs=in_specs,
            out_specs=pl.BlockSpec((tb_eff, OUT_FINAL), lambda i: (i, 0)),
        ),
        compiler_params=pltpu.CompilerParams(
            dimension_semantics=("parallel",)),
    )(ang, *flat)

    # (B, 7*24) channel-major -> (B, 24, 7) to match the PyTorch output layout.
    out = out_flat[:B].reshape(B, 7, NUM_LGT_SGS)
    return jnp.transpose(out, (0, 2, 1))


# ----------------------------------------------------------------------------
# Reference + init
# ----------------------------------------------------------------------------
def init_params(key):
    """Deterministic init matching the nn.Linear shapes (63->128->128->128->128->144)."""
    dims_in = [P_INPUT_DIM] + DIMS
    dims_out = DIMS + [OUT_RAW]
    params = []
    for di, do in zip(dims_in, dims_out):
        key, kw, kb = jax.random.split(key, 3)
        bound = 1.0 / np.sqrt(di)
        w = jax.random.uniform(kw, (di, do), jnp.float32, -bound, bound)
        b = jax.random.uniform(kb, (do,), jnp.float32, -bound, bound)
        params.append((w, b))
    return params


def irsg_reference(points, params):
    """Pure-JAX f32 replica of IRSGNetwork.forward for validation."""
    x = embed_points(points)
    for w, b in params[:-1]:
        x = jnp.maximum(x @ w + b, 0.0)
    w5, b5 = params[-1]
    out = (x @ w5 + b5).reshape(points.shape[0], NUM_LGT_SGS, 6)
    lobes = jax.nn.sigmoid(out[..., :2])
    theta = lobes[..., :1] * 2.0 * np.pi
    phi = lobes[..., 1:2] * 2.0 * np.pi
    lobes = jnp.concatenate(
        [jnp.cos(theta) * jnp.sin(phi), jnp.sin(theta) * jnp.sin(phi), jnp.cos(phi)],
        axis=-1)
    lam = jax.nn.sigmoid(out[..., 2:3]) * 30.0 + 0.1
    mu = jnp.maximum(out[..., 3:], 0.0)
    return jnp.concatenate([lobes, lam, mu], axis=-1)


if __name__ == "__main__":
    key = jax.random.PRNGKey(0)
    kp, kx = jax.random.split(key)
    params = init_params(kp)

    # Small deterministic batch.
    points = jax.random.uniform(kx, (16, 3), jnp.float32, -1.0, 1.0)
    out = jax.block_until_ready(irsg_forward(points, params))
    assert out.shape == (16, NUM_LGT_SGS, 7)
    ref = irsg_reference(points, params)
    np.testing.assert_allclose(np.asarray(out), np.asarray(ref), rtol=1e-2, atol=1e-2)

    # Non-multiple-of-8 batch exercises the cdiv / padding path.
    pts2 = jax.random.uniform(jax.random.PRNGKey(1), (13, 3), jnp.float32, -1.0, 1.0)
    out2 = jax.block_until_ready(irsg_forward(pts2, params))
    ref2 = irsg_reference(pts2, params)
    np.testing.assert_allclose(np.asarray(out2), np.asarray(ref2), rtol=1e-2, atol=1e-2)

    print("KERNEL_OK")
</pallas_src>

<mosaic_0001>
module attributes {stable_mosaic.version = 11 : i64} {
  func.func @_irsg_kernel(%arg0: i32, %arg1: memref<16x32xf32, #tpu.memory_space<vmem>>, %arg2: memref<3x128xf32, #tpu.memory_space<vmem>>, %arg3: memref<32x128xbf16, #tpu.memory_space<vmem>>, %arg4: memref<32x128xbf16, #tpu.memory_space<vmem>>, %arg5: memref<1x128xf32, #tpu.memory_space<vmem>>, %arg6: memref<128x128xbf16, #tpu.memory_space<vmem>>, %arg7: memref<1x128xf32, #tpu.memory_space<vmem>>, %arg8: memref<128x128xbf16, #tpu.memory_space<vmem>>, %arg9: memref<1x128xf32, #tpu.memory_space<vmem>>, %arg10: memref<128x128xbf16, #tpu.memory_space<vmem>>, %arg11: memref<1x128xf32, #tpu.memory_space<vmem>>, %arg12: memref<128x144xbf16, #tpu.memory_space<vmem>>, %arg13: memref<1x144xf32, #tpu.memory_space<vmem>>, %arg14: memref<16x168xf32, #tpu.memory_space<vmem>>) attributes {dimension_semantics = [#tpu.dimension_semantics<parallel>], iteration_bounds = array<i64: 1>, scalar_prefetch = 0 : i64, scratch_operands = 0 : i64, tpu.core_type = #tpu.core_type<tc>, window_params = [{transform_indices = @transform_0, window_bounds = array<i64: 16, 32>}, {pipeline_mode = #tpu.pipeline_mode<synchronous>, transform_indices = @transform_1, window_bounds = array<i64: 3, 128>}, {pipeline_mode = #tpu.pipeline_mode<synchronous>, transform_indices = @transform_2, window_bounds = array<i64: 32, 128>}, {pipeline_mode = #tpu.pipeline_mode<synchronous>, transform_indices = @transform_3, window_bounds = array<i64: 32, 128>}, {pipeline_mode = #tpu.pipeline_mode<synchronous>, transform_indices = @transform_4, window_bounds = array<i64: 1, 128>}, {pipeline_mode = #tpu.pipeline_mode<synchronous>, transform_indices = @transform_5, window_bounds = array<i64: 128, 128>}, {pipeline_mode = #tpu.pipeline_mode<synchronous>, transform_indices = @transform_6, window_bounds = array<i64: 1, 128>}, {pipeline_mode = #tpu.pipeline_mode<synchronous>, transform_indices = @transform_7, window_bounds = array<i64: 128, 128>}, {pipeline_mode = #tpu.pipeline_mode<synchronous>, transform_indices = @transform_8, window_bounds = array<i64: 1, 128>}, {pipeline_mode = #tpu.pipeline_mode<synchronous>, transform_indices = @transform_9, window_bounds = array<i64: 128, 128>}, {pipeline_mode = #tpu.pipeline_mode<synchronous>, transform_indices = @transform_10, window_bounds = array<i64: 1, 128>}, {pipeline_mode = #tpu.pipeline_mode<synchronous>, transform_indices = @transform_11, window_bounds = array<i64: 128, 144>}, {pipeline_mode = #tpu.pipeline_mode<synchronous>, transform_indices = @transform_12, window_bounds = array<i64: 1, 144>}, {transform_indices = @transform_13, window_bounds = array<i64: 16, 168>}]} {
    %c0 = arith.constant 0 : index
    %c0_0 = arith.constant 0 : index
    %0 = vector.load %arg1[%c0, %c0_0] : memref<16x32xf32, #tpu.memory_space<vmem>>, vector<16x32xf32>
    %1 = math.sin %0 : vector<16x32xf32>
    %2 = arith.truncf %1 : vector<16x32xf32> to vector<16x32xbf16>
    %3 = math.cos %0 : vector<16x32xf32>
    %4 = arith.truncf %3 : vector<16x32xf32> to vector<16x32xbf16>
    %c0_1 = arith.constant 0 : index
    %c0_2 = arith.constant 0 : index
    %5 = vector.load %arg3[%c0_1, %c0_2] : memref<32x128xbf16, #tpu.memory_space<vmem>>, vector<32x128xbf16>
    %cst = arith.constant dense<0.000000e+00> : vector<16x128xf32>
    %6 = tpu.matmul %2, %5, %cst {dimension_numbers = #tpu.dot_dimension_numbers<[1], [0], [0], [1], [0, 0, 1, 1], [], []>} : vector<16x32xbf16>, vector<32x128xbf16>, vector<16x128xf32> -> vector<16x128xf32>
    %c0_3 = arith.constant 0 : index
    %c0_4 = arith.constant 0 : index
    %7 = vector.load %arg4[%c0_3, %c0_4] : memref<32x128xbf16, #tpu.memory_space<vmem>>, vector<32x128xbf16>
    %cst_5 = arith.constant dense<0.000000e+00> : vector<16x128xf32>
    %8 = tpu.matmul %4, %7, %cst_5 {dimension_numbers = #tpu.dot_dimension_numbers<[1], [0], [0], [1], [0, 0, 1, 1], [], []>} : vector<16x32xbf16>, vector<32x128xbf16>, vector<16x128xf32> -> vector<16x128xf32>
    %9 = arith.addf %6, %8 : vector<16x128xf32>
    %c0_6 = arith.constant 0 : index
    %c0_7 = arith.constant 0 : index
    %10 = vector.load %arg2[%c0_6, %c0_7] : memref<3x128xf32, #tpu.memory_space<vmem>>, vector<3x128xf32>
    %11 = vector.extract_strided_slice %0 {offsets = [0, 0], sizes = [16, 1], strides = [1, 1]} : vector<16x32xf32> to vector<16x1xf32>
    %12 = vector.extract_strided_slice %10 {offsets = [0, 0], sizes = [1, 128], strides = [1, 1]} : vector<3x128xf32> to vector<1x128xf32>
    %13 = vector.broadcast %11 : vector<16x1xf32> to vector<16x128xf32>
    %14 = vector.broadcast %12 : vector<1x128xf32> to vector<16x128xf32>
    %15 = arith.mulf %13, %14 : vector<16x128xf32>
    %16 = arith.addf %9, %15 : vector<16x128xf32>
    %17 = vector.extract_strided_slice %0 {offsets = [0, 1], sizes = [16, 1], strides = [1, 1]} : vector<16x32xf32> to vector<16x1xf32>
    %18 = vector.extract_strided_slice %10 {offsets = [1, 0], sizes = [1, 128], strides = [1, 1]} : vector<3x128xf32> to vector<1x128xf32>
    %19 = vector.broadcast %17 : vector<16x1xf32> to vector<16x128xf32>
    %20 = vector.broadcast %18 : vector<1x128xf32> to vector<16x128xf32>
    %21 = arith.mulf %19, %20 : vector<16x128xf32>
    %22 = arith.addf %16, %21 : vector<16x128xf32>
    %23 = vector.extract_strided_slice %0 {offsets = [0, 2], sizes = [16, 1], strides = [1, 1]} : vector<16x32xf32> to vector<16x1xf32>
    %24 = vector.extract_strided_slice %10 {offsets = [2, 0], sizes = [1, 128], strides = [1, 1]} : vector<3x128xf32> to vector<1x128xf32>
    %25 = vector.broadcast %23 : vector<16x1xf32> to vector<16x128xf32>
    %26 = vector.broadcast %24 : vector<1x128xf32> to vector<16x128xf32>
    %27 = arith.mulf %25, %26 : vector<16x128xf32>
    %28 = arith.addf %22, %27 : vector<16x128xf32>
    %c0_8 = arith.constant 0 : index
    %c0_9 = arith.constant 0 : index
    %29 = vector.load %arg5[%c0_8, %c0_9] : memref<1x128xf32, #tpu.memory_space<vmem>>, vector<1x128xf32>
    %30 = vector.broadcast %29 : vector<1x128xf32> to vector<16x128xf32>
    %31 = arith.addf %28, %30 : vector<16x128xf32>
    %cst_10 = arith.constant 0.000000e+00 : f32
    %32 = vector.broadcast %cst_10 : f32 to vector<16x128xf32>
    %33 = arith.maximumf %31, %32 : vector<16x128xf32>
    %34 = arith.truncf %33 : vector<16x128xf32> to vector<16x128xbf16>
    %c0_11 = arith.constant 0 : index
    %c0_12 = arith.constant 0 : index
    %35 = vector.load %arg6[%c0_11, %c0_12] : memref<128x128xbf16, #tpu.memory_space<vmem>>, vector<128x128xbf16>
    %cst_13 = arith.constant dense<0.000000e+00> : vector<16x128xf32>
    %36 = tpu.matmul %34, %35, %cst_13 {dimension_numbers = #tpu.dot_dimension_numbers<[1], [0], [0], [1], [0, 0, 1, 1], [], []>} : vector<16x128xbf16>, vector<128x128xbf16>, vector<16x128xf32> -> vector<16x128xf32>
    %c0_14 = arith.constant 0 : index
    %c0_15 = arith.constant 0 : index
    %37 = vector.load %arg7[%c0_14, %c0_15] : memref<1x128xf32, #tpu.memory_space<vmem>>, vector<1x128xf32>
    %38 = vector.broadcast %37 : vector<1x128xf32> to vector<16x128xf32>
    %39 = arith.addf %36, %38 : vector<16x128xf32>
    %cst_16 = arith.constant 0.000000e+00 : f32
    %40 = vector.broadcast %cst_16 : f32 to vector<16x128xf32>
    %41 = arith.maximumf %39, %40 : vector<16x128xf32>
    %42 = arith.truncf %41 : vector<16x128xf32> to vector<16x128xbf16>
    %c0_17 = arith.constant 0 : index
    %c0_18 = arith.constant 0 : index
    %43 = vector.load %arg8[%c0_17, %c0_18] : memref<128x128xbf16, #tpu.memory_space<vmem>>, vector<128x128xbf16>
    %cst_19 = arith.constant dense<0.000000e+00> : vector<16x128xf32>
    %44 = tpu.matmul %42, %43, %cst_19 {dimension_numbers = #tpu.dot_dimension_numbers<[1], [0], [0], [1], [0, 0, 1, 1], [], []>} : vector<16x128xbf16>, vector<128x128xbf16>, vector<16x128xf32> -> vector<16x128xf32>
    %c0_20 = arith.constant 0 : index
    %c0_21 = arith.constant 0 : index
    %45 = vector.load %arg9[%c0_20, %c0_21] : memref<1x128xf32, #tpu.memory_space<vmem>>, vector<1x128xf32>
    %46 = vector.broadcast %45 : vector<1x128xf32> to vector<16x128xf32>
    %47 = arith.addf %44, %46 : vector<16x128xf32>
    %cst_22 = arith.constant 0.000000e+00 : f32
    %48 = vector.broadcast %cst_22 : f32 to vector<16x128xf32>
    %49 = arith.maximumf %47, %48 : vector<16x128xf32>
    %50 = arith.truncf %49 : vector<16x128xf32> to vector<16x128xbf16>
    %c0_23 = arith.constant 0 : index
    %c0_24 = arith.constant 0 : index
    %51 = vector.load %arg10[%c0_23, %c0_24] : memref<128x128xbf16, #tpu.memory_space<vmem>>, vector<128x128xbf16>
    %cst_25 = arith.constant dense<0.000000e+00> : vector<16x128xf32>
    %52 = tpu.matmul %50, %51, %cst_25 {dimension_numbers = #tpu.dot_dimension_numbers<[1], [0], [0], [1], [0, 0, 1, 1], [], []>} : vector<16x128xbf16>, vector<128x128xbf16>, vector<16x128xf32> -> vector<16x128xf32>
    %c0_26 = arith.constant 0 : index
    %c0_27 = arith.constant 0 : index
    %53 = vector.load %arg11[%c0_26, %c0_27] : memref<1x128xf32, #tpu.memory_space<vmem>>, vector<1x128xf32>
    %54 = vector.broadcast %53 : vector<1x128xf32> to vector<16x128xf32>
    %55 = arith.addf %52, %54 : vector<16x128xf32>
    %cst_28 = arith.constant 0.000000e+00 : f32
    %56 = vector.broadcast %cst_28 : f32 to vector<16x128xf32>
    %57 = arith.maximumf %55, %56 : vector<16x128xf32>
    %58 = arith.truncf %57 : vector<16x128xf32> to vector<16x128xbf16>
    %c0_29 = arith.constant 0 : index
    %c0_30 = arith.constant 0 : index
    %59 = vector.load %arg12[%c0_29, %c0_30] : memref<128x144xbf16, #tpu.memory_space<vmem>>, vector<128x144xbf16>
    %cst_31 = arith.constant dense<0.000000e+00> : vector<16x144xf32>
    %60 = tpu.matmul %58, %59, %cst_31 {dimension_numbers = #tpu.dot_dimension_numbers<[1], [0], [0], [1], [0, 0, 1, 1], [], []>} : vector<16x128xbf16>, vector<128x144xbf16>, vector<16x144xf32> -> vector<16x144xf32>
    %c0_32 = arith.constant 0 : index
    %c0_33 = arith.constant 0 : index
    %61 = vector.load %arg13[%c0_32, %c0_33] : memref<1x144xf32, #tpu.memory_space<vmem>>, vector<1x144xf32>
    %62 = vector.broadcast %61 : vector<1x144xf32> to vector<16x144xf32>
    %63 = arith.addf %60, %62 : vector<16x144xf32>
    %64 = vector.extract_strided_slice %63 {offsets = [0, 0], sizes = [16, 72], strides = [1, 1]} : vector<16x144xf32> to vector<16x72xf32>
    %65 = arith.negf %64 : vector<16x72xf32>
    %66 = math.exp %65 : vector<16x72xf32>
    %cst_34 = arith.constant 1.000000e+00 : f32
    %67 = vector.broadcast %cst_34 : f32 to vector<16x72xf32>
    %68 = arith.addf %67, %66 : vector<16x72xf32>
    %69 = arith.divf %67, %68 : vector<16x72xf32>
    %70 = vector.extract_strided_slice %69 {offsets = [0, 0], sizes = [16, 24], strides = [1, 1]} : vector<16x72xf32> to vector<16x24xf32>
    %cst_35 = arith.constant 6.28318548 : f32
    %71 = vector.broadcast %cst_35 : f32 to vector<16x24xf32>
    %72 = arith.mulf %70, %71 : vector<16x24xf32>
    %73 = vector.extract_strided_slice %69 {offsets = [0, 24], sizes = [16, 24], strides = [1, 1]} : vector<16x72xf32> to vector<16x24xf32>
    %cst_36 = arith.constant 6.28318548 : f32
    %74 = vector.broadcast %cst_36 : f32 to vector<16x24xf32>
    %75 = arith.mulf %73, %74 : vector<16x24xf32>
    %76 = vector.extract_strided_slice %69 {offsets = [0, 48], sizes = [16, 24], strides = [1, 1]} : vector<16x72xf32> to vector<16x24xf32>
    %cst_37 = arith.constant 3.000000e+01 : f32
    %77 = vector.broadcast %cst_37 : f32 to vector<16x24xf32>
    %78 = arith.mulf %76, %77 : vector<16x24xf32>
    %cst_38 = arith.constant 1.000000e-01 : f32
    %79 = vector.broadcast %cst_38 : f32 to vector<16x24xf32>
    %80 = arith.addf %78, %79 : vector<16x24xf32>
    %81 = vector.extract_strided_slice %63 {offsets = [0, 72], sizes = [16, 72], strides = [1, 1]} : vector<16x144xf32> to vector<16x72xf32>
    %cst_39 = arith.constant 0.000000e+00 : f32
    %82 = vector.broadcast %cst_39 : f32 to vector<16x72xf32>
    %83 = arith.maximumf %81, %82 : vector<16x72xf32>
    %84 = math.sin %75 : vector<16x24xf32>
    %85 = math.cos %72 : vector<16x24xf32>
    %86 = arith.mulf %85, %84 : vector<16x24xf32>
    %87 = math.sin %72 : vector<16x24xf32>
    %88 = arith.mulf %87, %84 : vector<16x24xf32>
    %89 = math.cos %75 : vector<16x24xf32>
    %90 = tpu.concatenate %86, %88, %89, %80, %83 in 1 : vector<16x24xf32>, vector<16x24xf32>, vector<16x24xf32>, vector<16x24xf32>, vector<16x72xf32> -> vector<16x168xf32>
    %c0_40 = arith.constant 0 : index
    %c0_41 = arith.constant 0 : index
    %91 = vector.load %arg14[%c0_40, %c0_41] : memref<16x168xf32, #tpu.memory_space<vmem>>, vector<16x168xf32>
    tpu.vector_store %arg14[%c0_40, %c0_41], %90 {strides = array<i32>} : memref<16x168xf32, #tpu.memory_space<vmem>>, vector<16x168xf32>,
    return
  }
  func.func @transform_0(%arg0: i32) -> (i32, i32) {
    %c0_i32 = arith.constant 0 : i32
    %c0_i32_0 = arith.constant 0 : i32
    return %arg0, %c0_i32 : i32, i32
  }
  func.func @transform_1(%arg0: i32) -> (i32, i32) {
    %c0_i32 = arith.constant 0 : i32
    %c0_i32_0 = arith.constant 0 : i32
    %c0_i32_1 = arith.constant 0 : i32
    return %c0_i32, %c0_i32_0 : i32, i32
  }
  func.func @transform_2(%arg0: i32) -> (i32, i32) {
    %c0_i32 = arith.constant 0 : i32
    %c0_i32_0 = arith.constant 0 : i32
    %c0_i32_1 = arith.constant 0 : i32
    return %c0_i32, %c0_i32_0 : i32, i32
  }
  func.func @transform_3(%arg0: i32) -> (i32, i32) {
    %c0_i32 = arith.constant 0 : i32
    %c0_i32_0 = arith.constant 0 : i32
    %c0_i32_1 = arith.constant 0 : i32
    return %c0_i32, %c0_i32_0 : i32, i32
  }
  func.func @transform_4(%arg0: i32) -> (i32, i32) {
    %c0_i32 = arith.constant 0 : i32
    %c0_i32_0 = arith.constant 0 : i32
    %c0_i32_1 = arith.constant 0 : i32
    return %c0_i32, %c0_i32_0 : i32, i32
  }
  func.func @transform_5(%arg0: i32) -> (i32, i32) {
    %c0_i32 = arith.constant 0 : i32
    %c0_i32_0 = arith.constant 0 : i32
    %c0_i32_1 = arith.constant 0 : i32
    return %c0_i32, %c0_i32_0 : i32, i32
  }
  func.func @transform_6(%arg0: i32) -> (i32, i32) {
    %c0_i32 = arith.constant 0 : i32
    %c0_i32_0 = arith.constant 0 : i32
    %c0_i32_1 = arith.constant 0 : i32
    return %c0_i32, %c0_i32_0 : i32, i32
  }
  func.func @transform_7(%arg0: i32) -> (i32, i32) {
    %c0_i32 = arith.constant 0 : i32
    %c0_i32_0 = arith.constant 0 : i32
    %c0_i32_1 = arith.constant 0 : i32
    return %c0_i32, %c0_i32_0 : i32, i32
  }
  func.func @transform_8(%arg0: i32) -> (i32, i32) {
    %c0_i32 = arith.constant 0 : i32
    %c0_i32_0 = arith.constant 0 : i32
    %c0_i32_1 = arith.constant 0 : i32
    return %c0_i32, %c0_i32_0 : i32, i32
  }
  func.func @transform_9(%arg0: i32) -> (i32, i32) {
    %c0_i32 = arith.constant 0 : i32
    %c0_i32_0 = arith.constant 0 : i32
    %c0_i32_1 = arith.constant 0 : i32
    return %c0_i32, %c0_i32_0 : i32, i32
  }
  func.func @transform_10(%arg0: i32) -> (i32, i32) {
    %c0_i32 = arith.constant 0 : i32
    %c0_i32_0 = arith.constant 0 : i32
    %c0_i32_1 = arith.constant 0 : i32
    return %c0_i32, %c0_i32_0 : i32, i32
  }
  func.func @transform_11(%arg0: i32) -> (i32, i32) {
    %c0_i32 = arith.constant 0 : i32
    %c0_i32_0 = arith.constant 0 : i32
    %c0_i32_1 = arith.constant 0 : i32
    return %c0_i32, %c0_i32_0 : i32, i32
  }
  func.func @transform_12(%arg0: i32) -> (i32, i32) {
    %c0_i32 = arith.constant 0 : i32
    %c0_i32_0 = arith.constant 0 : i32
    %c0_i32_1 = arith.constant 0 : i32
    return %c0_i32, %c0_i32_0 : i32, i32
  }
  func.func @transform_13(%arg0: i32) -> (i32, i32) {
    %c0_i32 = arith.constant 0 : i32
    %c0_i32_0 = arith.constant 0 : i32
    return %arg0, %c0_i32 : i32, i32
  }
}

</mosaic_0001>

<bundles_post_ra>
// kernel: tpu_custom_call.1
= control target key start
LH: loop header
LB: loop body
LE: loop exit
PB: predicated region body
PF: predicated region fallthrough
CT: control target
= control target key end

     0   :  { %18 = vsyncpa [#allocation3], 0  ;;  %s2690_s0 = inlined_call_operand.hbm [shape: f32[16,32], index: 0, kind: input, shape index: {}]   ;;  %s2691_s1 = inlined_call_operand.hbm [shape: f32[3,128], index: 1, kind: input, shape index: {}]   ;;  %s2692_s2 = inlined_call_operand.hbm [shape: bf16[32,128], index: 2, kind: input, shape index: {}]   ;;  %s2693_s3 = inlined_call_operand.vmem [shape: bf16[32,128], index: 3, kind: input, shape index: {}]   ;;  %s2694_s4 = inlined_call_operand.vmem [shape: f32[1,128], index: 4, kind: input, shape index: {}]   ;;  %s2695_s5 = inlined_call_operand.vmem [shape: bf16[128,128], index: 5, kind: input, shape index: {}]   ;;  %s2696_s6 = inlined_call_operand.vmem [shape: f32[1,128], index: 6, kind: input, shape index: {}]   ;;  %s2697_s7 = inlined_call_operand.vmem [shape: bf16[128,128], index: 7, kind: input, shape index: {}]   ;;  %s2698_s8 = inlined_call_operand.vmem [shape: f32[1,128], index: 8, kind: input, shape index: {}]   ;;  %s2699_s9 = inlined_call_operand.vmem [shape: bf16[128,128], index: 9, kind: input, shape index: {}]   ;;  %s2700_s10 = inlined_call_operand.vmem [shape: f32[1,128], index: 10, kind: input, shape index: {}]   ;;  %s2701_s11 = inlined_call_operand.vmem [shape: bf16[128,144], index: 11, kind: input, shape index: {}]   ;;  %s2702_s12 = inlined_call_operand.vmem [shape: f32[1,144], index: 12, kind: input, shape index: {}]   ;;  %s2703_s13 = inlined_call_operand.hbm [shape: f32[16,168], index: 13, kind: output, shape index: {}]  }
   0x1   :  { %19 = vsyncpa [#allocation6], 0 }
   0x2   :  { %20 = vsyncpa [#allocation4], 0  ;;  %s2114_s25 = smov [#allocation5]   ;;  %s2115_s27 = smov [#allocation2]  }
   0x3   :  { %s39_s26 = sshll.u32 %s2114_s25, 4  ;;  %s26_s28 = sshll.u32 %s2115_s27, 4  ;;  %s40_s26 = int_to_ptr.vmem [resolvable:$true] %s39_s26  ;;  %s2207_s28 = int_to_ptr.vmem [resolvable:$true] %s26_s28 }
   0x4   :  { %s2020_s14 = scalar_lea.hbm %s2691_s1, 64 }
   0x5   :  { %p2021_p0 = scmp.ne.s32.totalorder %s2691_s1, %s2020_s14  ;;  %p2024_p1 = scmp.lt.u32.totalorder %s2020_s14, %s2691_s1 }
   0x7   :  { %p2026_p2 = pnand %p2024_p1, %p2021_p0 }
   0x9   :  { %2029 = shalt.err (!%p2026_p2)
}
   0xa   :  { %s2030_s19 = scalar_lea.vmem %s40_s26, 64  ;;  %p2035_p4 = scmp.lt.s32.totalorder %s40_s26, %s40_s26 }
   0xb   :  { %p2031_p3 = scmp.ne.s32.totalorder %s40_s26, %s2030_s19  ;;  %p2036_p5 = scmp.lt.s32.totalorder %s2030_s19, %s2030_s19 }
   0xd   :  { %p2037_p6 = por %p2036_p5, %p2035_p4 }
   0xf   :  { %p2038_p7 = pnand %p2037_p6, %p2031_p3 }
  0x11   :  { %2041 = shalt.err (!%p2038_p7)
}
  0x12   :  { %42 = dma.hbm_to_vmem [thread:$0]  %s2691_s1, 64, %s40_s26, [#allocation6]  }
  0x13   :  { %s2042_s24 = scalar_lea.hbm %s2690_s0, 256 }
  0x14   :  { %p2043_p8 = scmp.ne.s32.totalorder %s2690_s0, %s2042_s24  ;;  %p2046_p9 = scmp.lt.u32.totalorder %s2042_s24, %s2690_s0 }
  0x16   :  { %p2048_p10 = pnand %p2046_p9, %p2043_p8 }
  0x18   :  { %2051 = shalt.err (!%p2048_p10)
}
  0x19   :  { %s2052_s14 = scalar_lea.vmem %s2207_s28, 256  ;;  %p2057_p12 = scmp.lt.s32.totalorder %s2207_s28, %s2207_s28 }
  0x1a   :  { %p2053_p11 = scmp.ne.s32.totalorder %s2207_s28, %s2052_s14  ;;  %p2058_p13 = scmp.lt.s32.totalorder %s2052_s14, %s2052_s14 }
  0x1c   :  { %p2059_p0 = por %p2058_p13, %p2057_p12 }
  0x1e   :  { %p2060_p1 = pnand %p2059_p0, %p2053_p11 }
  0x20   :  { %2063 = shalt.err (!%p2060_p1)
}
  0x21   :  { %s2116_s1 = smov 128   ;;  %s2117_s26 = smov 8  }
  0x22   :  { %32 = dma.hbm_to_vmem [thread:$0]  %s2690_s0, 256, %s2207_s28, [#allocation3], %s2116_s1, %s2116_s1, %s2117_s26  }
  0x23   :  { %s2118_s17 = smov [#allocation7]   ;;  %s2064_s21 = scalar_lea.hbm %s2692_s2, 256 }
  0x24   :  { %s48_s18 = sshll.u32 %s2118_s17, 4  ;;  %p2065_p2 = scmp.ne.s32.totalorder %s2692_s2, %s2064_s21  ;;  %s49_s18 = int_to_ptr.vmem [resolvable:$true] %s48_s18 }
  0x25   :  { %p2068_p3 = scmp.lt.u32.totalorder %s2064_s21, %s2692_s2 }
  0x27   :  { %p2070_p4 = pnand %p2068_p3, %p2065_p2 }
  0x29   :  { %2073 = shalt.err (!%p2070_p4)
}
  0x2a   :  { %s2074_s27 = scalar_lea.vmem %s49_s18, 256  ;;  %p2079_p6 = scmp.lt.s32.totalorder %s49_s18, %s49_s18 }
  0x2b   :  { %p2075_p5 = scmp.ne.s32.totalorder %s49_s18, %s2074_s27  ;;  %p2080_p7 = scmp.lt.s32.totalorder %s2074_s27, %s2074_s27 }
  0x2d   :  { %p2081_p8 = por %p2080_p7, %p2079_p6 }
  0x2f   :  { %p2082_p9 = pnand %p2081_p8, %p2075_p5 }
  0x31   :  { %2085 = shalt.err (!%p2082_p9)
}
  0x32   :  { %s2119_s0 = smov 64   ;;  %s2120_s28 = smov 4  }
  0x33   :  { %54 = dma.hbm_to_vmem [thread:$0]  %s2692_s2, 256, %s49_s18, [#allocation6], %s2119_s0, %s2119_s0, %s2120_s28  }
  0x34   :  { %2108 = dma.done.wait [#allocation3], 256  }
  0x35   :  { %2109 = vsyncadd [#allocation3], 4294967040 }
  0x36   :  { %2110 = dma.done.wait [#allocation6], 320  }
  0x37   :  { %2111 = vsyncadd [#allocation6], 4294966976  ;;  %v2121_v0 = vmov 0.0   ;;  %vm2122_vm0 = vmmov 0   ;;  %v2123_v1 = vmov 1   ;;  %v2124_v2 = vmov 0  }
  0x38   :  { %1825 = vmatprep.subr.bf16.mxu0 %v2121_v0  ;;  %1833 = vmatprep.subr.bf16.mxu1 %v2121_v0  ;;  %v1944_v3 = vld [vmem:[%s2693_s3] sm:$0xff]   ;;  %v1945_v4 = vld [vmem:[#allocation7] sm:$0xff]   ;;  %v1946_v5 = vld [vmem:[%s2693_s3 + $0x8] sm:$0xff]   ;;  %v2125_v25 = vmov 2   ;;  %v2126_v33 = vmov 683565275  }
  0x39   :  { %1829 = vmatprep.mubr.msk.bf16.mxu0 %vm2122_vm0, %v2121_v0  ;;  %1837 = vmatprep.mubr.msk.bf16.mxu1 %vm2122_vm0, %v2121_v0  ;;  %v1947_v6 = vld [vmem:[#allocation7 + $0x8] sm:$0xff]   ;;  %v2267_v8 = vld [vmem:[#allocation2 + $0x8] sm:$0xff]  ;;  %v2127_v35 = vmov 2475754826   ;;  %v2128_v37 = vmov 2131351028  }
  0x3a   :  { %1941 = vset.pattern.permute.xlu1 %v2123_v1  ;;  %1940 = vset.pattern.permute.xlu0 %v2124_v2  ;;  %v2265_v7 = vld [vmem:[#allocation2] sm:$0xff]  ;;  %v191_v11 = vand.u32 2147483647, %v2267_v8  ;;  %v194_v12 = vand.u32 2139095040, %v2267_v8  ;;  %v2129_v39 = vmov 2102212464  }
  0x3b   :  { %1826 = vmatpush3.bf16.msra.mxu0 %v1944_v3  ;;  %1834 = vmatpush3.bf16.msra.mxu1 %v1945_v4  ;;  %v87_v9 = vand.u32 2147483647, %v2265_v7  ;;  %v90_v10 = vand.u32 2139095040, %v2265_v7  ;;  %v2130_v41 = vmov 920167782   ;;  %vm89_vm15 = vcmp.lt.s32.totalorder %v2265_v7, 0 }
  0x3c   :  { %1827 = vmatprep.subr.bf16.mxu0 %v2121_v0  ;;  %1835 = vmatprep.subr.bf16.mxu1 %v2121_v0  ;;  %v195_v15 = vshrl.u32 %v194_v12, 23  ;;  %v198_v16 = vand.u32 8388607, %v191_v11  ;;  %v2131_v48 = vmov 1326507024  }
  0x3d   :  { %644 = vperm.xlu1 %1941, %v2265_v7   ;;  %627 = vperm.xlu0 %1940, %v2265_v7   ;;  %v91_v13 = vshrl.u32 %v90_v10, 23  ;;  %v94_v14 = vand.u32 8388607, %v87_v9 }
  0x3e   :  { %v1712_v19 = vadd.s32 4294967169, %v195_v15  ;;  %v199_v20 = vor.u32 8388608, %v198_v16 }
  0x3f   :  { %1828 = vmatpush3.bf16.msra.mxu0 %v1946_v5  ;;  %1836 = vmatpush3.bf16.msra.mxu1 %v1947_v6  ;;  %v1708_v17 = vadd.s32 4294967169, %v91_v13  ;;  %v95_v18 = vor.u32 8388608, %v94_v14 }
  0x40   :  { %1841 = vmatprep.subr.bf16.mxu0 %v2121_v0  ;;  %1861 = vmatprep.subr.bf16.mxu1 %v2121_v0  ;;  %v201_v23 = vadd.s32 1, %v1712_v19  ;;  %v2285_v24 = vshll.u32 %v199_v20, 8 }
  0x41   :  { %648 = vperm.xlu1 %1941, %v2267_v8   ;;  %632 = vperm.xlu0 %1940, %v2267_v8   ;;  %v97_v21 = vadd.s32 1, %v1708_v17  ;;  %v2283_v22 = vshll.u32 %v95_v18, 8 }
  0x42   :  { %vm202_vm2 = vcmp.gt.s32.totalorder %v201_v23, 0 }
  0x43   :  { %vm98_vm1 = vcmp.gt.s32.totalorder %v97_v21, 0  ;;  %v203_v29 = vsel %vm202_vm2, %v201_v23, 0  ;;  %vm193_vm2 = vcmp.lt.s32.totalorder %v2267_v8, 0 }
  0x44   :  { %v99_v26 = vsel %vm98_vm1, %v97_v21, 0  ;;  %v2289_v30 = vshrl.u32 %v203_v29, 5  ;;  %v205_v31 = vand.u32 31, %v203_v29  ;;  %vm88_vm1 = vcmp.le.f32.partialorder %v87_v9, 0.7853982 }
  0x45   :  { %1942 = vset.pattern.permute.xlu0 %v2125_v25  ;;  %1943 = vset.pattern.permute.xlu1 %v2125_v25  ;;  %v100_v27 = vshrl.u32 %v99_v26, 5  ;;  %v101_v28 = vand.u32 31, %v99_v26 }
  0x46   :  { %660 = vperm.xlu0 %1942, %v2265_v7   ;;  %664 = vperm.xlu1 %1943, %v2267_v8   ;;  %v206_v53 = vsub.s32 32, %v205_v31  ;;  %v208_v56 = vshll.u32 %v2126_v33, %v205_v31  ;;  %v211_v1 = vshll.u32 %v2127_v35, %v205_v31  ;;  %v214_v21 = vshll.u32 %v2128_v37, %v205_v31 }
  0x47   :  { %v102_v32 = vsub.s32 32, %v101_v28  ;;  %v104_v34 = vshll.u32 %v2126_v33, %v101_v28  ;;  %v107_v36 = vshll.u32 %v2127_v35, %v101_v28  ;;  %v110_v38 = vshll.u32 %v2128_v37, %v101_v28 }
  0x48   :  { %v113_v40 = vshll.u32 %v2129_v39, %v101_v28  ;;  %v116_v42 = vshll.u32 %v2130_v41, %v101_v28  ;;  %vm119_vm3 = vcmp.lt.s32.totalorder %v100_v27, 1  ;;  %vm120_vm4 = vcmp.lt.s32.totalorder %v100_v27, 2 }
  0x49   :  { %v103_v43 = vshrl.u32 %v2126_v33, %v102_v32  ;;  %v105_v44 = vshrl.u32 %v2127_v35, %v102_v32  ;;  %v108_v45 = vshrl.u32 %v2128_v37, %v102_v32  ;;  %v111_v46 = vshrl.u32 %v2129_v39, %v102_v32 }
  0x4a   :  { %v114_v47 = vshrl.u32 %v2130_v41, %v102_v32  ;;  %v117_v49 = vshrl.u32 %v2131_v48, %v102_v32  ;;  %vm121_vm5 = vcmp.lt.s32.totalorder %v100_v27, 3  ;;  %vm122_vm6 = vcmp.lt.s32.totalorder %v100_v27, 4 }
  0x4b   :  { %v106_v50 = vor.u32 %v105_v44, %v104_v34  ;;  %v109_v51 = vor.u32 %v108_v45, %v107_v36  ;;  %v112_v52 = vor.u32 %v111_v46, %v110_v38  ;;  %v207_v5 = vshrl.u32 %v2126_v33, %v206_v53 }
  0x4c   :  { %v115_v54 = vor.u32 %v114_v47, %v113_v40  ;;  %v118_v55 = vor.u32 %v117_v49, %v116_v42  ;;  %v209_v6 = vshrl.u32 %v2127_v35, %v206_v53  ;;  %v212_v14 = vshrl.u32 %v2128_v37, %v206_v53 }
  0x4d   :  { %v123_v57 = vsel %vm119_vm3, %v103_v43, %v106_v50  ;;  %v124_v58 = vsel %vm122_vm6, %v112_v52, 2102212464  ;;  %v127_v59 = vsel %vm119_vm3, %v106_v50, %v109_v51  ;;  %v131_v60 = vsel %vm119_vm3, %v109_v51, %v112_v52 }
  0x4e   :  { %v125_v61 = vsel %vm121_vm5, %v109_v51, %v124_v58  ;;  %v128_v62 = vsel %vm122_vm6, %v115_v54, 920167782  ;;  %v132_v63 = vsel %vm122_vm6, %v118_v55, 1326507024  ;;  %v210_v19 = vor.u32 %v209_v6, %v208_v56 }
  0x4f   :  { %v129_v3 = vsel %vm121_vm5, %v112_v52, %v128_v62  ;;  %v133_v4 = vsel %vm121_vm5, %v115_v54, %v132_v63  ;;  %v126_v10 = vsel %vm120_vm4, %v123_v57, %v125_v61  ;;  %v213_v20 = vor.u32 %v212_v14, %v211_v1 }
  0x50   :  { %v130_v12 = vsel %vm120_vm4, %v127_v59, %v129_v3  ;;  %v134_v13 = vsel %vm120_vm4, %v131_v60, %v133_v4  ;;  %v215_v23 = vshrl.u32 %v2129_v39, %v206_v53  ;;  %v217_v25 = vshll.u32 %v2129_v39, %v205_v31 }
  0x51   :  { %v2317_v15 = vmul.u32.u64.low %v2283_v22, %v134_v13  ;;  %v2318_v16 = vmul.u32.u64.high %v2283_v22, %v134_v13, %v2317_v15  ;;  %v2321_v17 = vmul.u32.u64.low %v2283_v22, %v130_v12  ;;  %v2322_v18 = vmul.u32.u64.high %v2283_v22, %v130_v12, %v2321_v17 }
  0x52   :  { %v218_v26 = vshrl.u32 %v2130_v41, %v206_v53  ;;  %v220_v27 = vshll.u32 %v2130_v41, %v205_v31  ;;  %v221_v28 = vshrl.u32 %v2131_v48, %v206_v53  ;;  %v142_v29 = vmul.u32 %v2283_v22, %v126_v10 }
  0x53   :  { %v216_v32 = vor.u32 %v215_v23, %v214_v21  ;;  %vm223_vm7 = vcmp.lt.s32.totalorder %v2289_v30, 1  ;;  %vm224_vm8 = vcmp.lt.s32.totalorder %v2289_v30, 2  ;;  %vm144_vm9 = vc.u32 %v2318_v16, %v2321_v17 }
  0x54   :  { %v145_v34 = vadd.s32 1, %v2322_v18  ;;  %v219_v36 = vor.u32 %v218_v26, %v217_v25  ;;  %vm225_vm10 = vcmp.lt.s32.totalorder %v2289_v30, 3  ;;  %v222_v38 = vor.u32 %v221_v28, %v220_v27 }
  0x55   :  { %vm226_vm11 = vcmp.lt.s32.totalorder %v2289_v30, 4  ;;  %v227_v31 = vsel %vm223_vm7, %v207_v5, %v210_v19  ;;  %v231_v40 = vsel %vm223_vm7, %v210_v19, %v213_v20  ;;  %v235_v44 = vsel %vm223_vm7, %v213_v20, %v216_v32 }
  0x56   :  { %v146_v42 = vsel %vm144_vm9, %v145_v34, %v2322_v18  ;;  %v228_v22 = vsel %vm226_vm11, %v216_v32, 2102212464  ;;  %v232_v43 = vsel %vm226_vm11, %v219_v36, 920167782  ;;  %v236_v49 = vsel %vm226_vm11, %v222_v38, 1326507024 }
  0x57   :  { %v147_v45 = vadd.s32 %v146_v42, %v142_v29  ;;  %v229_v46 = vsel %vm225_vm10, %v213_v20, %v228_v22  ;;  %v233_v47 = vsel %vm225_vm10, %v216_v32, %v232_v43  ;;  %v237_v52 = vsel %vm225_vm10, %v219_v36, %v236_v49 }
  0x58   :  { %v230_v50 = vsel %vm224_vm8, %v227_v31, %v229_v46  ;;  %v234_v51 = vsel %vm224_vm8, %v231_v40, %v233_v47  ;;  %v238_v54 = vsel %vm224_vm8, %v235_v44, %v237_v52  ;;  %v143_v15 = vadd.s32 %v2321_v17, %v2318_v16 }
  0x59   :  { %v148_v53 = vadd.s32 536870912, %v147_v45  ;;  %v2345_v55 = vmul.u32.u64.low %v2285_v24, %v234_v51  ;;  %v2346_v56 = vmul.u32.u64.high %v2285_v24, %v234_v51, %v2345_v55  ;;  %v246_v60 = vmul.u32 %v2285_v24, %v230_v50 }
  0x5a   :  { %v2349_v57 = vmul.u32.u64.low %v2285_v24, %v238_v54  ;;  %v2350_v58 = vmul.u32.u64.high %v2285_v24, %v238_v54, %v2349_v57  ;;  %vm192_vm3 = vcmp.le.f32.partialorder %v191_v11, 0.7853982  ;;  %vm179_vm10 = vweird.f32 %v2265_v7 }
  0x5b   :  { %v149_v59 = vshrl.u32 %v148_v53, 30  ;;  %v249_v62 = vadd.s32 1, %v2346_v56 }
  0x5c   :  { %vm248_vm12 = vc.u32 %v2350_v58, %v2345_v55  ;;  %v247_v38 = vadd.s32 %v2345_v55, %v2350_v58 }
  0x5d   :  { %v150_v61 = vshll.u32 %v149_v59, 30  ;;  %v250_v30 = vsel %vm248_vm12, %v249_v62, %v2346_v56  ;;  %v173_v46 = vsub.s32 4, %v149_v59 }
  0x5e   :  { %v251_v1 = vadd.s32 %v250_v30, %v246_v60 }
  0x5f   :  { %v151_v63 = vsub.s32 %v147_v45, %v150_v61  ;;  %v174_v54 = vsel %vm89_vm15, %v173_v46, %v149_v59  ;;  %v1955_v46 = vld [vmem:[%s2695_s5 + $0x38] sm:$0xff]  }
  0x60   :  { %v252_v4 = vadd.s32 536870912, %v251_v1  ;;  %v176_v57 = vsel %vm88_vm1, 0, %v174_v54  ;;  %v635_v54 = vlaneseq }
  0x61   :  { %v153_v3 = vsub.s32 0, %v151_v63  ;;  %v180_v61 = vadd.s32 3, %v176_v57 }
  0x62   :  { %v253_v6 = vshrl.u32 %v252_v4, 30 }
  0x63   :  { %v1709_v5 = vmin.u32 %v153_v3, %v151_v63  ;;  %v181_v3 = vand.u32 3, %v180_v61 }
  0x64   :  { %v254_v12 = vshll.u32 %v253_v6, 30  ;;  %v277_v56 = vsub.s32 4, %v253_v6 }
  0x65   :  { %v155_v10 = vclz %v1709_v5  ;;  %vm183_vm6 = vcmp.eq.s32.totalorder %v181_v3, 0  ;;  %vm186_vm7 = vcmp.eq.s32.totalorder %v181_v3, 2  ;;  %vm182_vm9 = vcmp.lt.s32.totalorder %v181_v3, 2 }
  0x66   :  { %v255_v14 = vsub.s32 %v251_v1, %v254_v12  ;;  %v278_v60 = vsel %vm193_vm2, %v277_v56, %v253_v6  ;;  %v389_v1 = vand.u32 3, %v176_v57 }
  0x67   :  { %v1710_v13 = vadd.s32 4294967294, %v155_v10  ;;  %v280_v30 = vsel %vm192_vm3, 0, %v278_v60 }
  0x68   :  { %v257_v18 = vsub.s32 0, %v255_v14  ;;  %v284_v5 = vadd.s32 3, %v280_v30  ;;  %vm391_vm4 = vcmp.eq.s32.totalorder %v389_v1, 0  ;;  %vm394_vm5 = vcmp.eq.s32.totalorder %v389_v1, 2 }
  0x69   :  { %vm1711_vm13 = vcmp.lt.s32.totalorder %v1710_v13, 0  ;;  %v492_v11 = vand.u32 3, %v280_v30  ;;  %vm390_vm8 = vcmp.lt.s32.totalorder %v389_v1, 2 }
  0x6a   :  { %v158_v24 = vsel %vm1711_vm13, 0, %v1710_v13  ;;  %v1713_v23 = vmin.u32 %v257_v18, %v255_v14  ;;  %v285_v6 = vand.u32 3, %v284_v5 }
  0x6b   :  { %v159_v19 = vsub.s32 32, %v158_v24  ;;  %v160_v20 = vshll.u32 %v151_v63, %v158_v24  ;;  %v163_v21 = vsub.s32 4294967266, %v158_v24  ;;  %vm494_vm11 = vcmp.eq.s32.totalorder %v492_v11, 0 }
  0x6c   :  { %v259_v27 = vclz %v1713_v23  ;;  %vm497_vm12 = vcmp.eq.s32.totalorder %v492_v11, 2  ;;  %vm290_vm13 = vcmp.eq.s32.totalorder %v285_v6, 2 }
  0x6d   :  { %v161_v25 = vshrl.u32 %v143_v15, %v159_v19  ;;  %v164_v26 = vadd.s32 127, %v163_v21 }
  0x6e   :  { %v1714_v32 = vadd.s32 4294967294, %v259_v27 }
  0x6f   :  { %v162_v28 = vor.u32 %v161_v25, %v160_v20  ;;  %v165_v29 = vshll.u32 %v164_v26, 23 }
  0x70   :  { %vm1715_vm14 = vcmp.lt.s32.totalorder %v1714_v32, 0 }
  0x71   :  { %v166_v34 = vor.u32 4788187, %v165_v29  ;;  %v169_v36 = vcvt.s32.f32 %v162_v28  ;;  %v262_v16 = vsel %vm1715_vm14, 0, %v1714_v32  ;;  %vm287_vm14 = vcmp.eq.s32.totalorder %v285_v6, 0 }
  0x72   :  { %v263_v17 = vsub.s32 32, %v262_v16  ;;  %v264_v40 = vshll.u32 %v255_v14, %v262_v16  ;;  %v267_v42 = vsub.s32 4294967266, %v262_v16 }
  0x73   :  { %v167_v31 = vand.u32 2147483647, %v166_v34 }
  0x74   :  { %v265_v43 = vshrl.u32 %v247_v38, %v263_v17  ;;  %v268_v44 = vadd.s32 127, %v267_v42  ;;  %v1948_v17 = vld [vmem:[%s2695_s5] sm:$0xff]   ;;  %v1950_v42 = vld [vmem:[%s2695_s5 + $0x10] sm:$0xff]  }
  0x75   :  { %v170_v22 = vmul.f32 %v169_v36, %v167_v31 }
  0x76   :  { %v266_v47 = vor.u32 %v265_v43, %v264_v40  ;;  %v269_v49 = vshll.u32 %v268_v44, 23  ;;  %v1952_v43 = vld [vmem:[%s2695_s5 + $0x20] sm:$0xff]   ;;  %v1953_v44 = vld [vmem:[%s2695_s5 + $0x28] sm:$0xff]  }
  0x77   :  { %v171_v45 = vxor.u32 2147483648, %v170_v22 }
  0x78   :  { %v270_v52 = vor.u32 4788187, %v269_v49  ;;  %v273_v53 = vcvt.s32.f32 %v266_v47  ;;  %v1956_v47 = vld [vmem:[%s2697_s7] sm:$0xff]   ;;  %v1957_v49 = vld [vmem:[%s2697_s7 + $0x8] sm:$0xff]  }
  0x79   :  { %v172_v50 = vsel %vm89_vm15, %v171_v45, %v170_v22  ;;  %vm493_vm15 = vcmp.lt.s32.totalorder %v492_v11, 2  ;;  %v1951_v22 = vld [vmem:[%s2695_s5 + $0x18] sm:$0xff]   ;;  %v1954_v45 = vld [vmem:[%s2695_s5 + $0x30] sm:$0xff]  }
  0x7a   :  { %v175_v51 = vsel %vm88_vm1, %v2265_v7, %v172_v50  ;;  %v271_v55 = vand.u32 2147483647, %v270_v52  ;;  %vm286_vm1 = vcmp.lt.s32.totalorder %v285_v6, 2  ;;  %v1949_v7 = vld [vmem:[%s2695_s5 + $0x8] sm:$0xff]   ;;  %v1958_v50 = vld [vmem:[%s2697_s7 + $0x10] sm:$0xff]   ;;  %v1960_v52 = vld [vmem:[%s2697_s7 + $0x20] sm:$0xff]  }
  0x7b   :  { %1996 = vcosq.f32 %v175_v51 }
  0x7c   :  { %1998 = vsinq.f32 %v175_v51  ;;  %v274_v58 = vmul.f32 %v273_v53, %v271_v55  ;;  %v1959_v51 = vld [vmem:[%s2697_s7 + $0x18] sm:$0xff]   ;;  %v1961_v53 = vld [vmem:[%s2697_s7 + $0x28] sm:$0xff]   ;;  %v2432_v55 = vshrl.u32 %v635_v54, 7 }
  0x7e   :  { %v275_v9 = vxor.u32 2147483648, %v274_v58  ;;  %v653_v60 = vsub.s32 1, %v2432_v55 }
  0x80   :  { %v276_v62 = vsel %vm193_vm2, %v275_v9, %v274_v58  ;;  %vm283_vm2 = vweird.f32 %v2267_v8  ;;  %v637_v58 = vsub.s32 0, %v2432_v55  ;;  %v624_v9 = vld [vmem:[#allocation5] sm:$0x7] }
  0x81   :  { %v279_v63 = vsel %vm192_vm3, %v2267_v8, %v276_v62  ;;  %vm523_vm3 = vcmask 261120  }
  0x82   :  { %2000 = vcosq.f32 %v279_v63  ;;  %v638_v30 = vrot.slane %v624_v9, %v637_v58 }
  0x83   :  { %2002 = vsinq.f32 %v279_v63  ;;  %v669_v63 = vsub.s32 2, %v2432_v55 }
  0x85   :  { %v1997_v59 = vpop.eup %1996  ;;  %v670_v1 = vrot.slane %v624_v9, %v669_v63  ;;  %v1971_v63 = vld [vmem:[%s2699_s9 + $0x38] sm:$0xff]  }
  0x86   :  { %v1999_v4 = vpop.eup %1998  ;;  %v187_v12 = vxor.u32 2147483648, %v1997_v59 }
  0x87   :  { %v184_v10 = vxor.u32 2147483648, %v1999_v4 }
  0x88   :  { %v396_v14 = vsel %vm394_vm5, %v187_v12, %v1999_v4  ;;  %v188_v24 = vsel %vm186_vm7, %v187_v12, %v1999_v4 }
  0x89   :  { %v393_v13 = vsel %vm391_vm4, %v1997_v59, %v184_v10  ;;  %v185_v15 = vsel %vm183_vm6, %v1997_v59, %v184_v10  ;;  %v654_v59 = vrot.slane %v624_v9, %v653_v60 }
  0x8a   :  { %v397_v21 = vsel %vm390_vm8, %v393_v13, %v396_v14  ;;  %v189_v23 = vsel %vm182_vm9, %v185_v15, %v188_v24 }
  0x8b   :  { %v398_v28 = vsel %vm179_vm10, nan, %v397_v21  ;;  %v190_v32 = vsel %vm179_vm10, nan, %v189_v23 }
  0x8c   :  { %v2001_v18 = vpop.eup %2000 }
  0x8d   :  { %v2003_v19 = vpop.eup %2002  ;;  %v291_v20 = vxor.u32 2147483648, %v2001_v18 }
  0x8e   :  { %v288_v25 = vxor.u32 2147483648, %v2003_v19 }
  0x8f   :  { %v499_v26 = vsel %vm497_vm12, %v291_v20, %v2003_v19  ;;  %v292_v27 = vsel %vm290_vm13, %v291_v20, %v2003_v19 }
  0x90   :  { %v496_v29 = vsel %vm494_vm11, %v2001_v18, %v288_v25  ;;  %v289_v34 = vsel %vm287_vm14, %v2001_v18, %v288_v25 }
  0x91   :  { %v500_v36 = vsel %vm493_vm15, %v496_v29, %v499_v26  ;;  %v293_v38 = vsel %vm286_vm1, %v289_v34, %v292_v27 }
  0x92   :  { %v501_v31 = vsel %vm283_vm2, nan, %v500_v36  ;;  %v294_v16 = vsel %vm283_vm2, nan, %v293_v38 }
  0x93   :  { %v502_v8 = vpack.c.bf16 %v501_v31, %v398_v28  ;;  %v295_v40 = vpack.c.bf16 %v294_v16, %v190_v32  ;;  %v1730_v32 = vld [vmem:[%s2694_s4] ss:$0 sm:$0xff] }
  0x95   :  { %1830 = vmatmul.mubr.msk.bf16.vlgmr.msra.gmra.mrb[0].mxu0 %vm523_vm3, %v502_v8  ;;  %1838 = vmatmul.mubr.msk.bf16.vlgmr.msra.gmra.mrb[0].mxu1 %vm523_vm3, %v295_v40 }
  0x96   :  { %1842 = vmatpush3.bf16.msra.mxu0 %v1948_v17  ;;  %1857 = vmatprep.mubr.msk.bf16.mxu0 %vm2122_vm0, %v2121_v0 }
  0x97   :  { %1843 = vmatprep.subr.bf16.mxu0 %v2121_v0  ;;  %1877 = vmatprep.mubr.msk.bf16.mxu1 %vm2122_vm0, %v2121_v0 }
  0x98   :  { %1862 = vmatpush3.bf16.msra.mxu1 %v1956_v47  ;;  %v1969_v47 = vld [vmem:[%s2699_s9 + $0x28] sm:$0xff]  }
  0x99   :  { %1863 = vmatprep.subr.bf16.mxu1 %v2121_v0 }
  0x9a   :  { %1844 = vmatpush3.bf16.msra.mxu0 %v1949_v7  ;;  %v1962_v7 = vld [vmem:[%s2697_s7 + $0x30] sm:$0xff]  }
  0x9b   :  { %1845 = vmatprep.subr.bf16.mxu0 %v2121_v0 }
  0x9c   :  { %1864 = vmatpush3.bf16.msra.mxu1 %v1957_v49  ;;  %v1731_v49 = vld [vmem:[%s2696_s6] ss:$0 sm:$0xff] }
  0x9d   :  { %1865 = vmatprep.subr.bf16.mxu1 %v2121_v0 }
  0x9e   :  { %1846 = vmatpush3.bf16.msra.mxu0 %v1950_v42  ;;  %v1963_v42 = vld [vmem:[%s2697_s7 + $0x38] sm:$0xff]  }
  0x9f   :  { %1847 = vmatprep.subr.bf16.mxu0 %v2121_v0 }
  0xa0   :  { %1866 = vmatpush3.bf16.msra.mxu1 %v1958_v50 }
  0xa1   :  { %1867 = vmatprep.subr.bf16.mxu1 %v2121_v0 }
  0xa2   :  { %1848 = vmatpush3.bf16.msra.mxu0 %v1951_v22  ;;  %v1964_v22 = vld [vmem:[%s2699_s9] sm:$0xff]  }
  0xa3   :  { %1849 = vmatprep.subr.bf16.mxu0 %v2121_v0 }
  0xa4   :  { %1868 = vmatpush3.bf16.msra.mxu1 %v1959_v51 }
  0xa5   :  { %1869 = vmatprep.subr.bf16.mxu1 %v2121_v0 }
  0xa6   :  { %1850 = vmatpush3.bf16.msra.mxu0 %v1952_v43  ;;  %v1965_v43 = vld [vmem:[%s2699_s9 + $0x8] sm:$0xff]  }
  0xa7   :  { %1851 = vmatprep.subr.bf16.mxu0 %v2121_v0 }
  0xa8   :  { %1870 = vmatpush3.bf16.msra.mxu1 %v1960_v52 }
  0xa9   :  { %1871 = vmatprep.subr.bf16.mxu1 %v2121_v0 }
  0xaa   :  { %1852 = vmatpush3.bf16.msra.mxu0 %v1953_v44  ;;  %v1966_v44 = vld [vmem:[%s2699_s9 + $0x10] sm:$0xff]  }
  0xab   :  { %1853 = vmatprep.subr.bf16.mxu0 %v2121_v0 }
  0xac   :  { %1872 = vmatpush3.bf16.msra.mxu1 %v1961_v53 }
  0xad   :  { %1873 = vmatprep.subr.bf16.mxu1 %v2121_v0 }
  0xae   :  { %1854 = vmatpush3.bf16.msra.mxu0 %v1954_v45  ;;  %v1967_v45 = vld [vmem:[%s2699_s9 + $0x18] sm:$0xff]  }
  0xaf   :  { %1855 = vmatprep.subr.bf16.mxu0 %v2121_v0 }
  0xb0   :  { %1874 = vmatpush3.bf16.msra.mxu1 %v1962_v7 }
  0xb1   :  { %1875 = vmatprep.subr.bf16.mxu1 %v2121_v0 }
  0xb2   :  { %1856 = vmatpush3.bf16.msra.mxu0 %v1955_v46  ;;  %v1968_v46 = vld [vmem:[%s2699_s9 + $0x20] sm:$0xff]  }
  0xb3   :  { %1881 = vmatprep.subr.bf16.mxu0 %v2121_v0 }
  0xb4   :  { %1876 = vmatpush3.bf16.msra.mxu1 %v1963_v42  ;;  %v1048_v42 = vld [vmem:[%s2702_s12] sm:$0x3]  ;;  %s2134_s12 = smov [#allocation8]  }
  0xb5   :  { %s1695_s28 = sshll.u32 %s2134_s12, 4  ;;  %s1696_s28 = int_to_ptr.vmem [resolvable:$true] %s1695_s28 }
  0xb6   :  { %s2086_s29 = scalar_lea.vmem %s1696_s28, 512  ;;  %p2091_p11 = scmp.lt.s32.totalorder %s1696_s28, %s1696_s28 }
  0xb7   :  { %p2087_p10 = scmp.ne.s32.totalorder %s1696_s28, %s2086_s29  ;;  %p2092_p12 = scmp.lt.s32.totalorder %s2086_s29, %s2086_s29 }
  0xb9   :  { %p2093_p13 = por %p2092_p12, %p2091_p11 }
  0xbb   :  { %p2094_p0 = pnand %p2093_p13, %p2087_p10 }
  0xbc   :  { %v645_v56 = vpop.permute.xlu1 %644  ;;  %v628_v57 = vpop.permute.xlu0 %627 }
  0xbd   :  { %v639_v12 = vmul.f32 %v638_v30, %v628_v57  ;;  %v655_v14 = vmul.f32 %v654_v59, %v645_v56 }
  0xc0   :  { %v649_v61 = vpop.permute.xlu1 %648  ;;  %v633_v62 = vpop.permute.xlu0 %632 }
  0xc1   :  { %v640_v18 = vmul.f32 %v638_v30, %v633_v62  ;;  %v656_v26 = vmul.f32 %v654_v59, %v649_v61  ;;  %v1970_v62 = vld [vmem:[%s2699_s9 + $0x30] sm:$0xff]   ;;  %v1972_v30 = vld [vmem:[%s2701_s11] ss:$8 sps:$4 sm:$0xff]  }
  0xc2   :  { %v1977_v59 = vld [vmem:[%s2701_s11 + $0x14] ss:$8 sps:$4 sm:$0xff]  }
  0xc5   :  { %v661_v3 = vpop.permute.xlu0 %660  ;;  %v665_v4 = vpop.permute.xlu1 %664 }
  0xc6   :  { %v671_v25 = vmul.f32 %v670_v1, %v661_v3  ;;  %v672_v29 = vmul.f32 %v670_v1, %v665_v4  ;;  %v1980_v1 = vld [vmem:[%s2701_s11 + $0x24] ss:$8 sps:$4 sm:$0xff]   ;;  %v1978_v3 = vld [vmem:[%s2701_s11 + $0x20] ss:$8 sps:$4 sm:$0xff]   ;;  %v1983_v4 = vld [vmem:[%s2701_s11 + $0x34] ss:$8 sps:$4 sm:$0xff]  }
 0x168   :  { %v561_v5 = vpop.f32.mrb[0].mxu0  ;;  %v617_v10 = vpop.f32.mrb[0].mxu1 }
 0x169   :  { %v618_v11 = vadd.f32 %v617_v10, %v561_v5  ;;  %v1831_v6 = vpop.f32.mrb[1].mxu0  ;;  %v1839_v13 = vpop.f32.mrb[1].mxu1  ;;  %v1981_v5 = vld [vmem:[%s2701_s11 + $0x30] ss:$8 sps:$4 sm:$0xff]   ;;  %v1986_v10 = vld [vmem:[%s2701_s11 + $0x44] ss:$8 sps:$4 sm:$0xff]  }
 0x16a   :  { %v564_v15 = vpop.f32.mrb[2].mxu0  ;;  %v620_v24 = vpop.f32.mrb[2].mxu1  ;;  %v1987_v6 = vld [vmem:[%s2701_s11 + $0x50] ss:$8 sps:$4 sm:$0xff]   ;;  %v1740_v13 = vld [vmem:[%s2698_s8] ss:$0 sm:$0xff] }
 0x16b   :  { %v641_v19 = vadd.f32 %v639_v12, %v618_v11  ;;  %v621_v20 = vadd.f32 %v620_v24, %v564_v15  ;;  %v1832_v21 = vpop.f32.mrb[3].mxu0  ;;  %v1840_v23 = vpop.f32.mrb[3].mxu1  ;;  %v1984_v12 = vld [vmem:[%s2701_s11 + $0x40] ss:$8 sps:$4 sm:$0xff]   ;;  %v1989_v11 = vld [vmem:[%s2701_s11 + $0x54] ss:$8 sps:$4 sm:$0xff]  }
 0x16d   :  { %v642_v27 = vadd.f32 %v640_v18, %v621_v20  ;;  %v657_v28 = vadd.f32 %v655_v14, %v641_v19 }
 0x16f   :  { %v673_v34 = vadd.f32 %v671_v25, %v657_v28  ;;  %v658_v36 = vadd.f32 %v656_v26, %v642_v27  ;;  %v1992_v26 = vld [vmem:[%s2701_s11 + $0x64] ss:$8 sps:$4 sm:$0xff]   ;;  %v1990_v27 = vld [vmem:[%s2701_s11 + $0x60] ss:$8 sps:$4 sm:$0xff]   ;;  %v1995_v28 = vld [vmem:[%s2701_s11 + $0x74] ss:$8 sps:$4 sm:$0xff]  }
 0x171   :  { %v682_v38 = vadd.f32 %v1730_v32, %v673_v34  ;;  %v674_v31 = vadd.f32 %v672_v29, %v658_v36  ;;  %v1993_v29 = vld [vmem:[%s2701_s11 + $0x70] ss:$8 sps:$4 sm:$0xff]  }
 0x173   :  { %v683_v16 = vadd.f32 %v1730_v32, %v674_v31  ;;  %v684_v17 = vmax.f32 %v682_v38, 0.0  ;;  %v1749_v32 = vld [vmem:[%s2700_s10] ss:$0 sm:$0xff]  ;;  %s2132_s10 = smov 104  }
 0x175   :  { %v685_v8 = vmax.f32 %v683_v16, 0.0 }
 0x177   :  { %v686_v40 = vpack.c.bf16 %v685_v8, %v684_v17 }
 0x179   :  { %1858 = vmatmul.mubr.bf16.vlgmr.msra.gmra.mrb[4].mxu0 %v686_v40 }
 0x17a   :  { %1897 = vmatprep.mubr.msk.bf16.mxu0 %vm2122_vm0, %v2121_v0  ;;  %1882 = vmatpush3.bf16.msra.mxu0 %v1964_v22  ;;  %v1053_v22 = vrot.slane %v1048_v42, %v637_v58 }
 0x17b   :  { %1883 = vmatprep.subr.bf16.mxu0 %v2121_v0 }
 0x17e   :  { %1884 = vmatpush3.bf16.msra.mxu0 %v1965_v43 }
 0x17f   :  { %1885 = vmatprep.subr.bf16.mxu0 %v2121_v0 }
 0x182   :  { %1886 = vmatpush3.bf16.msra.mxu0 %v1966_v44 }
 0x183   :  { %1887 = vmatprep.subr.bf16.mxu0 %v2121_v0 }
 0x186   :  { %1888 = vmatpush3.bf16.msra.mxu0 %v1967_v45 }
 0x187   :  { %1889 = vmatprep.subr.bf16.mxu0 %v2121_v0 }
 0x18a   :  { %1890 = vmatpush3.bf16.msra.mxu0 %v1968_v46  ;;  %v2553_v46 = vrot.slane %v1048_v42, %v653_v60 }
 0x18b   :  { %1891 = vmatprep.subr.bf16.mxu0 %v2121_v0 }
 0x18e   :  { %1892 = vmatpush3.bf16.msra.mxu0 %v1969_v47 }
 0x18f   :  { %1893 = vmatprep.subr.bf16.mxu0 %v2121_v0 }
 0x192   :  { %1894 = vmatpush3.bf16.msra.mxu0 %v1970_v62 }
 0x193   :  { %1895 = vmatprep.subr.bf16.mxu0 %v2121_v0  ;;  %v1975_v0 = vld [vmem:[%s2701_s11 + $0x10] ss:$8 sps:$4 sm:$0xff]  }
 0x196   :  { %1896 = vmatpush3.bf16.msra.mxu0 %v1971_v63 }
 0x24c   :  { %v792_v50 = vpop.f32.mrb[4].mxu0 }
 0x24d   :  { %v793_v51 = vadd.f32 %v1731_v49, %v792_v50  ;;  %v1859_v52 = vpop.f32.mrb[5].mxu0 }
 0x24e   :  { %v795_v53 = vpop.f32.mrb[6].mxu0 }
 0x24f   :  { %v796_v54 = vadd.f32 %v1731_v49, %v795_v53  ;;  %v1860_v56 = vpop.f32.mrb[7].mxu0  ;;  %v799_v57 = vmax.f32 %v793_v51, 0.0 }
 0x251   :  { %v800_v9 = vmax.f32 %v796_v54, 0.0 }
 0x253   :  { %v801_v61 = vpack.c.bf16 %v800_v9, %v799_v57 }
 0x255   :  { %1878 = vmatmul.mubr.bf16.vlgmr.msra.gmra.mrb[4].mxu1 %v801_v61 }
 0x256   :  { %1172 = vmatprep.mubr.bf16.mxu1 %v2124_v2  ;;  %v1974_v2 = vld [vmem:[%s2701_s11 + $0x4] ss:$8 sps:$4 sm:$0xff]   ;;  %s2133_s11 = smov 24  }
 0x257   :  { %1140 = vmatprep.subr.bf16.mxu1 %v1974_v2 }
 0x258   :  { %1141 = vmatpush1.bf16.msra.mxu1 %v1972_v30 }
 0x259   :  { %1142 = vmatprep.subr.bf16.mxu1 %v1977_v59 }
 0x25c   :  { %1143 = vmatpush1.bf16.msra.mxu1 %v1975_v0 }
 0x25d   :  { %1144 = vmatprep.subr.bf16.mxu1 %v1980_v1 }
 0x260   :  { %1145 = vmatpush1.bf16.msra.mxu1 %v1978_v3 }
 0x261   :  { %1146 = vmatprep.subr.bf16.mxu1 %v1983_v4 }
 0x264   :  { %1147 = vmatpush1.bf16.msra.mxu1 %v1981_v5 }
 0x265   :  { %1148 = vmatprep.subr.bf16.mxu1 %v1986_v10 }
 0x268   :  { %1149 = vmatpush1.bf16.msra.mxu1 %v1984_v12 }
 0x269   :  { %1150 = vmatprep.subr.bf16.mxu1 %v1989_v11 }
 0x26c   :  { %1151 = vmatpush1.bf16.msra.mxu1 %v1987_v6 }
 0x26d   :  { %1152 = vmatprep.subr.bf16.mxu1 %v1992_v26 }
 0x270   :  { %1153 = vmatpush1.bf16.msra.mxu1 %v1990_v27 }
 0x271   :  { %1154 = vmatprep.subr.bf16.mxu1 %v1995_v28 }
 0x274   :  { %1155 = vmatpush1.bf16.msra.mxu1 %v1993_v29 }
 0x328   :  { %v907_v14 = vpop.f32.mrb[4].mxu1 }
 0x329   :  { %v908_v15 = vadd.f32 %v1740_v13, %v907_v14  ;;  %v1879_v24 = vpop.f32.mrb[5].mxu1 }
 0x32a   :  { %v910_v18 = vpop.f32.mrb[6].mxu1 }
 0x32b   :  { %v911_v19 = vadd.f32 %v1740_v13, %v910_v18  ;;  %v1880_v20 = vpop.f32.mrb[7].mxu1  ;;  %v914_v21 = vmax.f32 %v908_v15, 0.0 }
 0x32d   :  { %v915_v23 = vmax.f32 %v911_v19, 0.0 }
 0x32f   :  { %v916_v25 = vpack.c.bf16 %v915_v23, %v914_v21 }
 0x331   :  { %1898 = vmatmul.mubr.bf16.vlgmr.msra.gmra.mrb[8].mxu0 %v916_v25 }
 0x404   :  { %v1022_v34 = vpop.f32.mrb[8].mxu0 }
 0x405   :  { %v1023_v36 = vadd.f32 %v1749_v32, %v1022_v34  ;;  %v1899_v38 = vpop.f32.mrb[9].mxu0 }
 0x406   :  { %v1025_v31 = vpop.f32.mrb[10].mxu0 }
 0x407   :  { %v1026_v16 = vadd.f32 %v1749_v32, %v1025_v31  ;;  %v1900_v17 = vpop.f32.mrb[11].mxu0  ;;  %v1029_v8 = vmax.f32 %v1023_v36, 0.0 }
 0x409   :  { %v1030_v40 = vmax.f32 %v1026_v16, 0.0 }
 0x40b   :  { %v1031_v7 = vpack.c.bf16 %v1030_v40, %v1029_v8 }
 0x40d   :  { %1173 = vmatmul.mubr.bf16.vlgmr.msra.gmra.mrb[8].mxu1 %v1031_v7 }
 0x4e0   :  { %v1174_v43 = vpop.f32.mrb[8].mxu1 }
 0x4e1   :  { %v2547_v44 = vadd.f32 %v1174_v43, %v1053_v22  ;;  %v2549_v45 = vpop.f32.mrb[9].mxu1 }
 0x4e2   :  { %v1178_v47 = vpop.f32.mrb[10].mxu1 }
 0x4e3   :  { %v1774_v49 = vmul.f32 -1.442695, %v2547_v44  ;;  %v2556_v50 = vadd.f32 %v1178_v47, %v1053_v22  ;;  %v1180_v51 = vpop.f32.mrb[11].mxu1 }
 0x4e4   :  { %v2559_v52 = vadd.f32 %v1180_v51, %v2553_v46 }
 0x4e5   :  { %2004 = vpow2.f32 %v1774_v49  ;;  %v1775_v58 = vmul.f32 -1.442695, %v2556_v50 }
 0x4e7   :  { %2006 = vpow2.f32 %v1775_v58 }
 0x4ef   :  { %v2005_v53 = vpop.eup %2004 }
 0x4f0   :  { %v1189_v54 = vadd.f32 1.0, %v2005_v53 }
 0x4f1   :  { %v2007_v56 = vpop.eup %2006 }
 0x4f2   :  { %2008 = vrcp.f32 %v1189_v54  ;;  %v1190_v55 = vadd.f32 1.0, %v2007_v56 }
 0x4f4   :  { %2010 = vrcp.f32 %v1190_v55 }
 0x4fc   :  { %v2562_v60 = vpop.eup %2008 }
 0x4fd   :  { %v2565_v57 = vmul.f32 6.2831855, %v2562_v60 }
 0x4fe   :  { %v2567_v9 = vpop.eup %2010 }
 0x4ff   :  { %v1205_v61 = vand.u32 2147483647, %v2565_v57  ;;  %v1208_v62 = vand.u32 2139095040, %v2565_v57  ;;  %v2572_v63 = vmul.f32 6.2831855, %v2567_v9  ;;  %vm1207_vm2 = vcmp.lt.s32.totalorder %v2565_v57, 0 }
 0x501   :  { %v1209_v30 = vshrl.u32 %v1208_v62, 23  ;;  %v1212_v2 = vand.u32 8388607, %v1205_v61  ;;  %v1312_v59 = vand.u32 2139095040, %v2572_v63  ;;  %v1309_v1 = vand.u32 2147483647, %v2572_v63 }
 0x502   :  { %vm1206_vm3 = vcmp.le.f32.partialorder %v1205_v61, 0.7853982 }
 0x503   :  { %v1776_v0 = vadd.s32 4294967169, %v1209_v30  ;;  %v1313_v3 = vshrl.u32 %v1312_v59, 23  ;;  %v1213_v5 = vor.u32 8388608, %v1212_v2  ;;  %v1316_v12 = vand.u32 8388607, %v1309_v1 }
 0x505   :  { %v1215_v4 = vadd.s32 1, %v1776_v0  ;;  %v1780_v10 = vadd.s32 4294967169, %v1313_v3  ;;  %v2580_v15 = vshll.u32 %v1213_v5, 8  ;;  %v1317_v19 = vor.u32 8388608, %v1316_v12 }
 0x507   :  { %vm1216_vm0 = vcmp.gt.s32.totalorder %v1215_v4, 0  ;;  %v1319_v6 = vadd.s32 1, %v1780_v10  ;;  %v1357_v56 = vshll.u32 %v1317_v19, 8 }
 0x508   :  { %v1217_v11 = vsel %vm1216_vm0, %v1215_v4, 0  ;;  %vm1311_vm0 = vcmp.lt.s32.totalorder %v2572_v63, 0 }
 0x509   :  { %v1218_v13 = vshrl.u32 %v1217_v11, 5  ;;  %v1219_v14 = vand.u32 31, %v1217_v11  ;;  %vm1320_vm4 = vcmp.gt.s32.totalorder %v1319_v6, 0 }
 0x50a   :  { %v1321_v16 = vsel %vm1320_vm4, %v1319_v6, 0  ;;  %vm1310_vm4 = vcmp.le.f32.partialorder %v1309_v1, 0.7853982 }
 0x50b   :  { %v1220_v24 = vsub.s32 32, %v1219_v14  ;;  %v1222_v18 = vshll.u32 %v2126_v33, %v1219_v14  ;;  %v1225_v20 = vshll.u32 %v2127_v35, %v1219_v14  ;;  %v1228_v21 = vshll.u32 %v2128_v37, %v1219_v14 }
 0x50c   :  { %v1231_v23 = vshll.u32 %v2129_v39, %v1219_v14  ;;  %v1234_v25 = vshll.u32 %v2130_v41, %v1219_v14  ;;  %vm1237_vm5 = vcmp.lt.s32.totalorder %v1218_v13, 1  ;;  %vm1239_vm6 = vcmp.lt.s32.totalorder %v1218_v13, 3 }
 0x50d   :  { %v1223_v26 = vshrl.u32 %v2127_v35, %v1220_v24  ;;  %v1226_v27 = vshrl.u32 %v2128_v37, %v1220_v24  ;;  %v1229_v28 = vshrl.u32 %v2129_v39, %v1220_v24  ;;  %v1221_v29 = vshrl.u32 %v2126_v33, %v1220_v24 }
 0x50e   :  { %v1232_v32 = vshrl.u32 %v2130_v41, %v1220_v24  ;;  %v1235_v34 = vshrl.u32 %v2131_v48, %v1220_v24  ;;  %vm1240_vm7 = vcmp.lt.s32.totalorder %v1218_v13, 4  ;;  %v1323_v40 = vand.u32 31, %v1321_v16 }
 0x50f   :  { %v1224_v36 = vor.u32 %v1223_v26, %v1222_v18  ;;  %v1227_v38 = vor.u32 %v1226_v27, %v1225_v20  ;;  %v1230_v31 = vor.u32 %v1229_v28, %v1228_v21  ;;  %vm1238_vm8 = vcmp.lt.s32.totalorder %v1218_v13, 2 }
 0x510   :  { %v1233_v17 = vor.u32 %v1232_v32, %v1231_v23  ;;  %v1236_v8 = vor.u32 %v1235_v34, %v1234_v25  ;;  %v1324_v58 = vsub.s32 32, %v1323_v40  ;;  %v1322_v2 = vshrl.u32 %v1321_v16, 5 }
 0x511   :  { %v1241_v7 = vsel %vm1237_vm5, %v1221_v29, %v1224_v36  ;;  %v1242_v42 = vsel %vm1240_vm7, %v1230_v31, 2102212464  ;;  %v1245_v22 = vsel %vm1237_vm5, %v1224_v36, %v1227_v38  ;;  %v1249_v43 = vsel %vm1237_vm5, %v1227_v38, %v1230_v31 }
 0x512   :  { %v1243_v47 = vsel %vm1239_vm6, %v1227_v38, %v1242_v42  ;;  %v1246_v49 = vsel %vm1240_vm7, %v1233_v17, 920167782  ;;  %v1250_v51 = vsel %vm1240_vm7, %v1236_v8, 1326507024  ;;  %v1326_v5 = vshll.u32 %v2126_v33, %v1323_v40 }
 0x513   :  { %v1247_v53 = vsel %vm1239_vm6, %v1230_v31, %v1246_v49  ;;  %v1251_v54 = vsel %vm1239_vm6, %v1233_v17, %v1250_v51  ;;  %v1244_v55 = vsel %vm1238_vm8, %v1241_v7, %v1243_v47  ;;  %v1327_v10 = vshrl.u32 %v2127_v35, %v1324_v58 }
 0x514   :  { %v1248_v62 = vsel %vm1238_vm8, %v1245_v22, %v1247_v53  ;;  %v1252_v30 = vsel %vm1238_vm8, %v1249_v43, %v1251_v54  ;;  %v1329_v12 = vshll.u32 %v2127_v35, %v1323_v40  ;;  %v1330_v11 = vshrl.u32 %v2128_v37, %v1324_v58 }
 0x515   :  { %v2601_v59 = vmul.u32.u64.low %v2580_v15, %v1252_v30  ;;  %v2602_v0 = vmul.u32.u64.high %v2580_v15, %v1252_v30, %v2601_v59  ;;  %v2605_v3 = vmul.u32.u64.low %v2580_v15, %v1248_v62  ;;  %v2606_v4 = vmul.u32.u64.high %v2580_v15, %v1248_v62, %v2605_v3 }
 0x516   :  { %v1332_v6 = vshll.u32 %v2128_v37, %v1323_v40  ;;  %v1333_v13 = vshrl.u32 %v2129_v39, %v1324_v58  ;;  %v1335_v14 = vshll.u32 %v2129_v39, %v1323_v40  ;;  %v1336_v24 = vshrl.u32 %v2130_v41, %v1324_v58 }
 0x517   :  { %v1328_v18 = vor.u32 %v1327_v10, %v1326_v5  ;;  %v1331_v19 = vor.u32 %v1330_v11, %v1329_v12  ;;  %v1338_v20 = vshll.u32 %v2130_v41, %v1323_v40  ;;  %v1339_v21 = vshrl.u32 %v2131_v48, %v1324_v58 }
 0x518   :  { %v1260_v23 = vmul.u32 %v2580_v15, %v1244_v55  ;;  %vm1262_vm9 = vc.u32 %v2602_v0, %v2605_v3  ;;  %v1263_v35 = vadd.s32 1, %v2606_v4  ;;  %v1334_v37 = vor.u32 %v1333_v13, %v1332_v6 }
 0x519   :  { %v1325_v25 = vshrl.u32 %v2126_v33, %v1324_v58  ;;  %v1337_v26 = vor.u32 %v1336_v24, %v1335_v14  ;;  %v1340_v39 = vor.u32 %v1339_v21, %v1338_v20  ;;  %vm1341_vm10 = vcmp.lt.s32.totalorder %v1322_v2, 1 }
 0x51a   :  { %v1264_v27 = vsel %vm1262_vm9, %v1263_v35, %v2606_v4  ;;  %vm1343_vm11 = vcmp.lt.s32.totalorder %v1322_v2, 3  ;;  %vm1344_vm12 = vcmp.lt.s32.totalorder %v1322_v2, 4  ;;  %v1349_v41 = vsel %vm1341_vm10, %v1328_v18, %v1331_v19 }
 0x51b   :  { %v1265_v28 = vadd.s32 %v1264_v27, %v1260_v23  ;;  %v1346_v48 = vsel %vm1344_vm12, %v1334_v37, 2102212464  ;;  %v1350_v29 = vsel %vm1344_vm12, %v1337_v26, 920167782  ;;  %v1353_v15 = vsel %vm1341_vm10, %v1331_v19, %v1334_v37 }
 0x51c   :  { %vm1342_vm13 = vcmp.lt.s32.totalorder %v1322_v2, 2  ;;  %v1345_v32 = vsel %vm1341_vm10, %v1325_v25, %v1328_v18  ;;  %v1351_v34 = vsel %vm1343_vm11, %v1334_v37, %v1350_v29  ;;  %v1354_v36 = vsel %vm1344_vm12, %v1340_v39, 1326507024 }
 0x51d   :  { %v1266_v38 = vadd.s32 536870912, %v1265_v28  ;;  %v1347_v31 = vsel %vm1343_vm11, %v1331_v19, %v1346_v48  ;;  %v1352_v16 = vsel %vm1342_vm13, %v1349_v41, %v1351_v34  ;;  %v1355_v33 = vsel %vm1343_vm11, %v1337_v26, %v1354_v36 }
 0x51e   :  { %v1356_v17 = vsel %vm1342_vm13, %v1353_v15, %v1355_v33  ;;  %v2625_v8 = vmul.u32.u64.low %v1357_v56, %v1352_v16  ;;  %v2626_v40 = vmul.u32.u64.high %v1357_v56, %v1352_v16, %v2625_v8  ;;  %v1348_v43 = vsel %vm1342_vm13, %v1345_v32, %v1347_v31 }
 0x51f   :  { %v1267_v7 = vshrl.u32 %v1266_v38, 30  ;;  %v2628_v42 = vmul.u32.u64.low %v1357_v56, %v1356_v17  ;;  %v2629_v22 = vmul.u32.u64.high %v1357_v56, %v1356_v17, %v2628_v42  ;;  %v1364_v58 = vmul.u32 %v1357_v56, %v1348_v43 }
 0x520   :  { %v1367_v49 = vadd.s32 1, %v2626_v40  ;;  %v1261_v11 = vadd.s32 %v2605_v3, %v2602_v0  ;;  %vm1297_vm11 = vweird.f32 %v2565_v57 }
 0x521   :  { %v1268_v47 = vshll.u32 %v1267_v7, 30  ;;  %vm1366_vm14 = vc.u32 %v2629_v22, %v2625_v8  ;;  %v1291_v27 = vsub.s32 4, %v1267_v7  ;;  %v1365_v0 = vadd.s32 %v2625_v8, %v2629_v22 }
 0x522   :  { %v1368_v53 = vsel %vm1366_vm14, %v1367_v49, %v2626_v40 }
 0x523   :  { %v1269_v51 = vsub.s32 %v1265_v28, %v1268_v47  ;;  %v1369_v55 = vadd.s32 %v1368_v53, %v1364_v58  ;;  %v1292_v36 = vsel %vm1207_vm2, %v1291_v27, %v1267_v7 }
 0x524   :  { %v1294_v33 = vsel %vm1206_vm3, 0, %v1292_v36 }
 0x525   :  { %v1271_v54 = vsub.s32 0, %v1269_v51  ;;  %v1370_v30 = vadd.s32 536870912, %v1369_v55  ;;  %v1298_v42 = vadd.s32 3, %v1294_v33  ;;  %v1506_v49 = vand.u32 3, %v1294_v33 }
 0x527   :  { %v1777_v62 = vmin.u32 %v1271_v54, %v1269_v51  ;;  %v1371_v59 = vshrl.u32 %v1370_v30, 30  ;;  %vm1511_vm5 = vcmp.eq.s32.totalorder %v1506_v49, 2  ;;  %vm1508_vm8 = vcmp.eq.s32.totalorder %v1506_v49, 0 }
 0x528   :  { %vm1507_vm10 = vcmp.lt.s32.totalorder %v1506_v49, 2 }
 0x529   :  { %v1273_v2 = vclz %v1777_v62  ;;  %v1372_v5 = vshll.u32 %v1371_v59, 30  ;;  %v1395_v43 = vsub.s32 4, %v1371_v59 }
 0x52b   :  { %v1778_v4 = vadd.s32 4294967294, %v1273_v2  ;;  %v1373_v12 = vsub.s32 %v1369_v55, %v1372_v5  ;;  %v1396_v7 = vsel %vm1311_vm0, %v1395_v43, %v1371_v59 }
 0x52c   :  { %v1398_v30 = vsel %vm1310_vm4, 0, %v1396_v7 }
 0x52d   :  { %vm1779_vm15 = vcmp.lt.s32.totalorder %v1778_v4, 0  ;;  %v1375_v13 = vsub.s32 0, %v1373_v12 }
 0x52e   :  { %v1276_v10 = vsel %vm1779_vm15, 0, %v1778_v4  ;;  %vm1401_vm15 = vweird.f32 %v2572_v63 }
 0x52f   :  { %v1277_v6 = vsub.s32 32, %v1276_v10  ;;  %v1281_v56 = vsub.s32 4294967266, %v1276_v10  ;;  %v1278_v14 = vshll.u32 %v1269_v51, %v1276_v10  ;;  %v1781_v19 = vmin.u32 %v1375_v13, %v1373_v12 }
 0x530   :  { %v1299_v51 = vand.u32 3, %v1298_v42  ;;  %v1402_v10 = vadd.s32 3, %v1398_v30  ;;  %v1197_v13 = vmul.f32 30.0, %v2562_v60  ;;  %v1198_v60 = vmul.f32 30.0, %v2567_v9 }
 0x531   :  { %v1279_v24 = vshrl.u32 %v1261_v11, %v1277_v6  ;;  %v1282_v18 = vadd.s32 127, %v1281_v56  ;;  %v1377_v23 = vclz %v1781_v19 }
 0x532   :  { %vm1304_vm6 = vcmp.eq.s32.totalorder %v1299_v51, 2  ;;  %vm1301_vm7 = vcmp.eq.s32.totalorder %v1299_v51, 0  ;;  %vm1300_vm9 = vcmp.lt.s32.totalorder %v1299_v51, 2  ;;  %v1403_v56 = vand.u32 3, %v1402_v10 }
 0x533   :  { %v1280_v20 = vor.u32 %v1279_v24, %v1278_v14  ;;  %v1283_v21 = vshll.u32 %v1282_v18, 23  ;;  %v1782_v37 = vadd.s32 4294967294, %v1377_v23 }
 0x534   :  { %vm1408_vm12 = vcmp.eq.s32.totalorder %v1403_v56, 2  ;;  %vm1405_vm13 = vcmp.eq.s32.totalorder %v1403_v56, 0  ;;  %vm1404_vm14 = vcmp.lt.s32.totalorder %v1403_v56, 2 }
 0x535   :  { %v1284_v35 = vor.u32 4788187, %v1283_v21  ;;  %v1287_v26 = vcvt.s32.f32 %v1280_v20  ;;  %vm1783_vm1 = vcmp.lt.s32.totalorder %v1782_v37, 0  ;;  %v1199_v20 = vadd.f32 0.1, %v1197_v13 }
 0x536   :  { %v1380_v41 = vsel %vm1783_vm1, 0, %v1782_v37 }
 0x537   :  { %v1285_v25 = vand.u32 2147483647, %v1284_v35  ;;  %v1381_v3 = vsub.s32 32, %v1380_v41  ;;  %v1385_v28 = vsub.s32 4294967266, %v1380_v41  ;;  %v1382_v29 = vshll.u32 %v1373_v12, %v1380_v41 }
 0x538   :  { %v1201_v35 = vmax.f32 %v2547_v44, 0.0 }
 0x539   :  { %v1288_v39 = vmul.f32 %v1287_v26, %v1285_v25  ;;  %v1383_v15 = vshrl.u32 %v1365_v0, %v1381_v3  ;;  %v1386_v32 = vadd.s32 127, %v1385_v28  ;;  %v1609_v25 = vand.u32 3, %v1398_v30 }
 0x53a   :  { %v1177_v26 = vadd.f32 %v2549_v45, %v2553_v46  ;;  %v1203_v45 = vmax.f32 %v2556_v50, 0.0 }
 0x53b   :  { %v1289_v48 = vxor.u32 2147483648, %v1288_v39  ;;  %v1384_v31 = vor.u32 %v1383_v15, %v1382_v29  ;;  %v1387_v16 = vshll.u32 %v1386_v32, 23  ;;  %vm1611_vm1 = vcmp.eq.s32.totalorder %v1609_v25, 0 }
 0x53c   :  { %v1202_v9 = vmax.f32 %v1177_v26, 0.0 }
 0x53d   :  { %v1290_v34 = vsel %vm1207_vm2, %v1289_v48, %v1288_v39  ;;  %v1388_v17 = vor.u32 4788187, %v1387_v16  ;;  %v1391_v40 = vcvt.s32.f32 %v1384_v31  ;;  %v1200_v39 = vadd.f32 0.1, %v1198_v60 }
 0x53e   :  { %v1293_v38 = vsel %vm1206_vm3, %v2565_v57, %v1290_v34  ;;  %vm1614_vm2 = vcmp.eq.s32.totalorder %v1609_v25, 2  ;;  %vm1610_vm3 = vcmp.lt.s32.totalorder %v1609_v25, 2 }
 0x53f   :  { %2012 = vcosq.f32 %v1293_v38  ;;  %v1389_v8 = vand.u32 2147483647, %v1388_v17 }
 0x540   :  { %2014 = vsinq.f32 %v1293_v38 }
 0x541   :  { %v1392_v22 = vmul.f32 %v1391_v40, %v1389_v8 }
 0x543   :  { %v1393_v47 = vxor.u32 2147483648, %v1392_v22 }
 0x545   :  { %v1394_v61 = vsel %vm1311_vm0, %v1393_v47, %v1392_v22  ;;  %vm1667_vm0 = vcmask 195584  }
 0x546   :  { %v1397_v53 = vsel %vm1310_vm4, %v2572_v63, %v1394_v61  ;;  %v1204_v63 = vmax.f32 %v2559_v52, 0.0  ;;  %vm1686_vm4 = vcmask 326656  }
 0x547   :  { %2016 = vcosq.f32 %v1397_v53 }
 0x548   :  { %2018 = vsinq.f32 %v1397_v53 }
 0x549   :  { %v2013_v58 = vpop.eup %2012 }
 0x54a   :  { %v2015_v54 = vpop.eup %2014  ;;  %v1305_v55 = vxor.u32 2147483648, %v2013_v58 }
 0x54b   :  { %v1302_v62 = vxor.u32 2147483648, %v2015_v54 }
 0x54c   :  { %v1306_v2 = vsel %vm1304_vm6, %v1305_v55, %v2015_v54  ;;  %v1513_v4 = vsel %vm1511_vm5, %v1305_v55, %v2015_v54  ;;  %vm1676_vm5 = vcmask 392192   ;;  %vm1679_vm6 = vcmask 588800  }
 0x54d   :  { %v1303_v5 = vsel %vm1301_vm7, %v2013_v58, %v1302_v62  ;;  %v1510_v1 = vsel %vm1508_vm8, %v2013_v58, %v1302_v62  ;;  %vm1682_vm7 = vcmask 785408  }
 0x54e   :  { %v1307_v59 = vsel %vm1300_vm9, %v1303_v5, %v1306_v2  ;;  %v1514_v12 = vsel %vm1507_vm10, %v1510_v1, %v1513_v4 }
 0x54f   :  { %v1308_v11 = vsel %vm1297_vm11, nan, %v1307_v59  ;;  %v1515_v6 = vsel %vm1297_vm11, nan, %v1514_v12 }
 0x550   :  { %1621 = vrot.lane.b32.xlu1 %v1308_v11, %s2132_s10 }
 0x551   :  { %v2017_v14 = vpop.eup %2016 }
 0x552   :  { %v2019_v24 = vpop.eup %2018  ;;  %v1409_v18 = vxor.u32 2147483648, %v2017_v14 }
 0x553   :  { %v1406_v19 = vxor.u32 2147483648, %v2019_v24 }
 0x554   :  { %1641 = vrot.lane.b32.xlu1 %v1515_v6, %s2133_s11  ;;  %v1410_v57 = vsel %vm1408_vm12, %v1409_v18, %v2019_v24  ;;  %v1616_v41 = vsel %vm1614_vm2, %v1409_v18, %v2019_v24 }
 0x555   :  { %v1407_v21 = vsel %vm1405_vm13, %v2017_v14, %v1406_v19  ;;  %v1613_v27 = vsel %vm1611_vm1, %v2017_v14, %v1406_v19 }
 0x556   :  { %v1411_v23 = vsel %vm1404_vm14, %v1407_v21, %v1410_v57  ;;  %v1617_v44 = vsel %vm1610_vm3, %v1613_v27, %v1616_v41 }
 0x557   :  { %v1412_v37 = vsel %vm1401_vm15, nan, %v1411_v23  ;;  %v1618_v0 = vsel %vm1401_vm15, nan, %v1617_v44 }
 0x558   :  { %1649 = vrot.lane.b32.xlu1 %v1199_v20, %s2133_s11  ;;  %1623 = vrot.lane.b32.xlu0 %v1412_v37, %s2132_s10 }
 0x55c   :  { %1659 = vrot.lane.b32.xlu1 %v1201_v35, %s2133_s11  ;;  %1651 = vrot.lane.b32.xlu0 %v1200_v39, %s2133_s11 }
 0x560   :  { %1661 = vrot.lane.b32.xlu0 %v1202_v9, %s2133_s11 }
 0x564   :  { %1643 = vrot.lane.b32.xlu0 %v1618_v0, %s2133_s11 }
 0x5c2   :  { %v1622_v3 = vpop.permute.xlu1 %1621 }
 0x5c3   :  { %v1629_v28 = vmul.f32 %v1622_v3, %v1308_v11  ;;  %v1627_v50 = vmul.f32 %v1622_v3, %v1515_v6 }
 0x5c5   :  { %1633 = vrot.lane.b32.xlu1 %v1629_v28, %s2133_s11 }
 0x5c6   :  { %v1642_v46 = vpop.permute.xlu1 %1641 }
 0x5c9   :  { %1663 = vrot.lane.b32.xlu1 %v1203_v45, %s2133_s11 }
 0x5ca   :  { %v1624_v48 = vpop.permute.xlu0 %1623  ;;  %v1650_v29 = vpop.permute.xlu1 %1649 }
 0x5cb   :  { %v1630_v15 = vmul.f32 %v1624_v48, %v1412_v37  ;;  %v1628_v40 = vmul.f32 %v1624_v48, %v1618_v0 }
 0x5cd   :  { %1635 = vrot.lane.b32.xlu0 %v1630_v15, %s2133_s11 }
 0x5ce   :  { %v1652_v32 = vpop.permute.xlu0 %1651  ;;  %v1660_v34 = vpop.permute.xlu1 %1659 }
 0x5d1   :  { %1665 = vrot.lane.b32.xlu0 %v1204_v63, %s2133_s11 }
 0x5d2   :  { %v1662_v36 = vpop.permute.xlu0 %1661 }
 0x5d3   :  { %v1668_v38 = vsel %vm1667_vm0, %v1660_v34, %v1662_v36 }
 0x5d4   :  { %1687 = vst.msk [vmem:[#allocation8 + $0x8] sm:$0xff] %vm1686_vm4, %v1668_v38 }
 0x5d6   :  { %v1644_v8 = vpop.permute.xlu0 %1643 }
 0x637   :  { %v1634_v31 = vpop.permute.xlu1 %1633 }
 0x638   :  { %v1674_v16 = vsel %vm1667_vm0, %v1627_v50, %v1634_v31 }
 0x639   :  { %v1677_v33 = vsel %vm1676_vm5, %v1674_v16, %v1642_v46 }
 0x63a   :  { %v1680_v52 = vsel %vm1679_vm6, %v1677_v33, %v1650_v29 }
 0x63b   :  { %v1683_v17 = vsel %vm1682_vm7, %v1680_v52, %v1660_v34  ;;  %v1664_v43 = vpop.permute.xlu1 %1663 }
 0x63c   :  { %1685 = vst [vmem:[#allocation8] sm:$0xff] %v1683_v17 }
 0x63f   :  { %v1636_v42 = vpop.permute.xlu0 %1635 }
 0x640   :  { %v1675_v22 = vsel %vm1667_vm0, %v1628_v40, %v1636_v42 }
 0x641   :  { %v1678_v47 = vsel %vm1676_vm5, %v1675_v22, %v1644_v8 }
 0x642   :  { %v1681_v49 = vsel %vm1679_vm6, %v1678_v47, %v1652_v32 }
 0x643   :  { %v1684_v51 = vsel %vm1682_vm7, %v1681_v49, %v1664_v43  ;;  %v1666_v61 = vpop.permute.xlu0 %1665 }
 0x644   :  { %1688 = vst [vmem:[#allocation8 + $0x10] sm:$0xff] %v1684_v51  ;;  %v1669_v7 = vsel %vm1667_vm0, %v1664_v43, %v1666_v61 }
 0x645   :  { %1689 = vst.msk [vmem:[#allocation8 + $0x18] sm:$0xff] %vm1686_vm4, %v1669_v7 }
 0x646   :  { %2097 = shalt.err (!%p2094_p0)
}
 0x647   :  { %s2098_s2 = scalar_lea.hbm %s2703_s13, 512 }
 0x648   :  { %p2099_p1 = scmp.ne.s32.totalorder %s2703_s13, %s2098_s2  ;;  %p2102_p2 = scmp.lt.u32.totalorder %s2098_s2, %s2703_s13 }
 0x64a   :  { %p2104_p3 = pnand %p2102_p2, %p2099_p1 }
 0x64c   :  { %2107 = shalt.err (!%p2104_p3)
}
 0x64d   :  { %s2135_s5 = smov 256   ;;  %s2136_s15 = smov 16  }
 0x64e   :  { %1701 = dma.vmem_to_hbm [thread:$0]  %s1696_s28, 512, %s2703_s13, [#allocation4], %s2135_s5, %s2135_s5, %s2136_s15  }
 0x64f   :  { %2112 = dma.done.wait [#allocation4], 512  }
 0x650   :  { %2113 = vsyncadd [#allocation4], 4294966784 }
 0x651   :  { %1705 = vsyncpa [#allocation3], 1 }
 0x652   :  { %1706 = vsyncpa [#allocation6], 1 }
 0x653   :  { %1707 = vsyncpa [#allocation4], 1 }

</bundles_post_ra>
